<compile_context>
chip_gen: v7x
topology: tpu7x:2x2x1
jax: 0.10.0
libtpu: 0.0.40
codegen_flags: <defaults>
</compile_context>

<pallas_src>
import functools

import jax
import jax.numpy as jnp
from jax.experimental import pallas as pl
from jax.experimental.pallas import tpu as pltpu


# ----------------------- fused kernel -----------------------

def _fused_attn_kernel(x_ref, wqkv_ref, wo_ref, bo_ref, out_ref, *,
                       num_heads, head_dim):
    # x_ref: (n, dim) slab of one batch element (batch picked by the grid via
    # the (n, b*dim) view of x).
    n, dim = x_ref.shape
    H, hd = num_heads, head_dim

    x = x_ref[...]                                        # (n, dim) f32
    # Broadcast x across heads so every matmul below is a plain leading-batch
    # batched matmul (the proven Mosaic dot_general form); ~64 KB VMEM.
    xb = jnp.broadcast_to(x, (H, n, dim))                 # (H, n, dim)

    # Fused Q/K/V projection straight into head-major layout:
    #   qkv[h, i, :] = x[i, :] @ Wqkv[h],  Wqkv[h]: (dim, 3*hd)
    # sqrt(head_dim) query scaling is already folded into the Q weight slice.
    qkv = jnp.einsum("hic,hcd->hid", xb, wqkv_ref[...],
                     preferred_element_type=jnp.float32)  # (H, n, 3*hd)
    q = qkv[:, :, 0:hd]
    k = qkv[:, :, hd:2 * hd]
    v = qkv[:, :, 2 * hd:3 * hd]

    # Scaled dot-product attention, all heads batched in one einsum.
    s = jnp.einsum("hqd,hkd->hqk", q, k,
                   preferred_element_type=jnp.float32)    # (H, n, n)
    s = s - jnp.max(s, axis=-1, keepdims=True)            # stable softmax
    p = jnp.exp(s)
    denom = jnp.sum(p, axis=-1, keepdims=True)
    p = p / denom                                         # exact normalization
    # TODO(synk): attn_dropout treated as identity (inference mode); training
    # dropout on the attention weights is not implemented.

    attn = jnp.einsum("hqk,hkd->hqd", p, v,
                      preferred_element_type=jnp.float32)  # (H, n, hd)

    # Output projection, per head then reduced over heads:
    #   out[i, e] = sum_h attn[h, i, :] @ Wo[h]  (Wo[h]: (hd, dim))  + bias
    out = jnp.einsum("hid,hde->hie", attn, wo_ref[...],
                     preferred_element_type=jnp.float32)   # (H, n, dim)
    out = jnp.sum(out, axis=0) + bo_ref[...]               # (n, dim) lane-dense
    out_ref[...] = out.astype(out_ref.dtype)


# ----------------------- module wrapper -----------------------

def self_attention_full(x, wq, wk, wv, wo, bo, num_heads):
    """x: (n, b, dim); wq/wk/wv/wo: (dim, dim) PyTorch (out, in) layout; bo: (dim,)."""
    n, b, dim = x.shape
    hd = dim // num_heads
    scaling = float(hd) ** 0.5

    # --- one-time weight layout prep (tiny; constant-folds under jit) ---
    # Reorganize (out, in) weights to head-major (H, dim_in, hd) so the kernel
    # projects directly into (H, n, hd) with no in-kernel transposes.
    def to_head_major(w):                                  # (dim, dim) -> (H, dim, hd)
        return w.reshape(num_heads, hd, dim).transpose(0, 2, 1)

    wqkv = jnp.concatenate(
        [to_head_major(wq) * scaling,                      # fold sqrt(hd) into Wq
         to_head_major(wk),
         to_head_major(wv)], axis=-1)                      # (H, dim, 3*hd)
    wo_t = wo.reshape(dim, num_heads, hd).transpose(1, 2, 0)   # (H, hd, dim)
    bo2 = bo.reshape(1, dim)

    # (n, b, dim) -> (n, b*dim) is a free contiguous reshape: batch j occupies
    # lane columns [j*dim, (j+1)*dim), so the grid slices it with a 128-aligned
    # BlockSpec -- no XLA transpose of x or of the output.
    x2 = x.reshape(n, b * dim)

    kern = functools.partial(_fused_attn_kernel, num_heads=num_heads, head_dim=hd)
    out2 = pl.pallas_call(
        kern,
        out_shape=jax.ShapeDtypeStruct((n, b * dim), x.dtype),
        grid_spec=pl.GridSpec(
            grid=(b,),
            in_specs=[
                pl.BlockSpec((n, dim), lambda j: (0, j)),                     # x, batch j
                pl.BlockSpec((num_heads, dim, 3 * hd), lambda j: (0, 0, 0)),  # Wqkv
                pl.BlockSpec((num_heads, hd, dim), lambda j: (0, 0, 0)),      # Wo
                pl.BlockSpec((1, dim), lambda j: (0, 0)),                     # bias
            ],
            out_specs=pl.BlockSpec((n, dim), lambda j: (0, j)),
        ),
        compiler_params=pltpu.CompilerParams(
            dimension_semantics=("parallel",),   # batch-parallel -> 2 TCs on v7x
        ),
    )(x2, wqkv, wo_t, bo2)
    return out2.reshape(n, b, dim)


# ----------------------- pure-JAX reference -----------------------

def reference(x, wq, wk, wv, wo, bo, num_heads):
    n, b, dim = x.shape
    hd = dim // num_heads
    scaling = float(hd) ** 0.5
    q = x @ wq.T
    k = x @ wk.T
    v = x @ wv.T
    qh = (q * scaling).reshape(n, b * num_heads, hd).transpose(1, 0, 2)
    kh = k.reshape(n, b * num_heads, hd).transpose(1, 0, 2)
    vh = v.reshape(n, b * num_heads, hd).transpose(1, 0, 2)
    s = jnp.einsum("gnd,gmd->gnm", qh, kh)
    p = jax.nn.softmax(s, axis=2)
    o = jnp.einsum("gnm,gmd->gnd", p, vh)
    o = o.transpose(1, 0, 2).reshape(n, b, dim)
    return o @ wo.T + bo


if __name__ == "__main__":
    # Small shapes consistent with the module (dim=128, heads=8 as in the spec;
    # reduced seq/batch): n=16, b=4, dim=128, heads=8 -> head_dim=16.
    n, b, dim, heads = 16, 4, 128, 8

    key = jax.random.PRNGKey(0)
    kx, kq, kk, kv, ko, kb = jax.random.split(key, 6)
    x = jax.random.normal(kx, (n, b, dim), dtype=jnp.float32)
    wq = jax.random.normal(kq, (dim, dim), dtype=jnp.float32) * 0.1
    wk = jax.random.normal(kk, (dim, dim), dtype=jnp.float32) * 0.1
    wv = jax.random.normal(kv, (dim, dim), dtype=jnp.float32) * 0.1
    wo = jax.random.normal(ko, (dim, dim), dtype=jnp.float32) * 0.1
    bo = jax.random.normal(kb, (dim,), dtype=jnp.float32) * 0.1

    fn = jax.jit(functools.partial(self_attention_full, num_heads=heads))
    out = fn(x, wq, wk, wv, wo, bo)
    out = jax.block_until_ready(out)

    ref = reference(x, wq, wk, wv, wo, bo, heads)
    assert out.shape == (n, b, dim), out.shape
    max_err = float(jnp.max(jnp.abs(out - ref)))
    assert jnp.allclose(out, ref, atol=1e-3, rtol=1e-3), (
        f"mismatch vs reference: max abs err {max_err}")
    print("KERNEL_OK")
</pallas_src>

<mosaic_0001>
module attributes {stable_mosaic.version = 11 : i64} {
  func.func @_fused_attn_kernel(%arg0: i32, %arg1: memref<16x128xf32, #tpu.memory_space<vmem>>, %arg2: memref<8x128x48xf32, #tpu.memory_space<vmem>>, %arg3: memref<8x16x128xf32, #tpu.memory_space<vmem>>, %arg4: memref<1x128xf32, #tpu.memory_space<vmem>>, %arg5: memref<16x128xf32, #tpu.memory_space<vmem>>) attributes {dimension_semantics = [#tpu.dimension_semantics<parallel>], iteration_bounds = array<i64: 4>, scalar_prefetch = 0 : i64, scratch_operands = 0 : i64, tpu.core_type = #tpu.core_type<tc>, window_params = [{transform_indices = @transform_0, window_bounds = array<i64: 16, 128>}, {pipeline_mode = #tpu.pipeline_mode<synchronous>, transform_indices = @transform_1, window_bounds = array<i64: 8, 128, 48>}, {pipeline_mode = #tpu.pipeline_mode<synchronous>, transform_indices = @transform_2, window_bounds = array<i64: 8, 16, 128>}, {pipeline_mode = #tpu.pipeline_mode<synchronous>, transform_indices = @transform_3, window_bounds = array<i64: 1, 128>}, {transform_indices = @transform_4, window_bounds = array<i64: 16, 128>}]} {
    %c0 = arith.constant 0 : index
    %c0_0 = arith.constant 0 : index
    %0 = vector.load %arg1[%c0, %c0_0] : memref<16x128xf32, #tpu.memory_space<vmem>>, vector<16x128xf32>
    %1 = vector.shape_cast %0 : vector<16x128xf32> to vector<1x16x128xf32>
    %2 = vector.broadcast %1 : vector<1x16x128xf32> to vector<8x16x128xf32>
    %c0_1 = arith.constant 0 : index
    %c0_2 = arith.constant 0 : index
    %c0_3 = arith.constant 0 : index
    %3 = vector.load %arg2[%c0_1, %c0_2, %c0_3] : memref<8x128x48xf32, #tpu.memory_space<vmem>>, vector<8x128x48xf32>
    "tpu.trace_start"() <{level = 10 : i32, message = "hic,hcd->hid"}> : () -> ()
    %cst = arith.constant dense<0.000000e+00> : vector<8x16x48xf32>
    %4 = tpu.matmul %2, %3, %cst {dimension_numbers = #tpu.dot_dimension_numbers<[2], [1], [1], [2], [0, 0, 0, 1, 1, 2], [0], [0]>} : vector<8x16x128xf32>, vector<8x128x48xf32>, vector<8x16x48xf32> -> vector<8x16x48xf32>
    "tpu.trace_stop"() : () -> ()
    %5 = vector.extract_strided_slice %4 {offsets = [0, 0, 0], sizes = [8, 16, 16], strides = [1, 1, 1]} : vector<8x16x48xf32> to vector<8x16x16xf32>
    %6 = vector.extract_strided_slice %4 {offsets = [0, 0, 16], sizes = [8, 16, 16], strides = [1, 1, 1]} : vector<8x16x48xf32> to vector<8x16x16xf32>
    %7 = vector.extract_strided_slice %4 {offsets = [0, 0, 32], sizes = [8, 16, 16], strides = [1, 1, 1]} : vector<8x16x48xf32> to vector<8x16x16xf32>
    "tpu.trace_start"() <{level = 10 : i32, message = "hqd,hkd->hqk"}> : () -> ()
    %cst_4 = arith.constant dense<0.000000e+00> : vector<8x16x16xf32>
    %8 = tpu.matmul %5, %6, %cst_4 {dimension_numbers = #tpu.dot_dimension_numbers<[2], [2], [1], [1], [0, 0, 0, 1, 1, 1], [0], [0]>} : vector<8x16x16xf32>, vector<8x16x16xf32>, vector<8x16x16xf32> -> vector<8x16x16xf32>
    "tpu.trace_stop"() : () -> ()
    %cst_5 = arith.constant dense<0xFF800000> : vector<8x16xf32>
    %9 = vector.multi_reduction <maximumf>, %8, %cst_5 [2] : vector<8x16x16xf32> to vector<8x16xf32>
    %10 = vector.shape_cast %9 : vector<8x16xf32> to vector<8x16x1xf32>
    %11 = vector.broadcast %10 : vector<8x16x1xf32> to vector<8x16x16xf32>
    %12 = arith.subf %8, %11 : vector<8x16x16xf32>
    %13 = math.exp %12 : vector<8x16x16xf32>
    %cst_6 = arith.constant dense<0.000000e+00> : vector<8x16xf32>
    %14 = vector.multi_reduction <add>, %13, %cst_6 [2] : vector<8x16x16xf32> to vector<8x16xf32>
    %15 = vector.shape_cast %14 : vector<8x16xf32> to vector<8x16x1xf32>
    %16 = vector.broadcast %15 : vector<8x16x1xf32> to vector<8x16x16xf32>
    %17 = arith.divf %13, %16 : vector<8x16x16xf32>
    "tpu.trace_start"() <{level = 10 : i32, message = "hqk,hkd->hqd"}> : () -> ()
    %cst_7 = arith.constant dense<0.000000e+00> : vector<8x16x16xf32>
    %18 = tpu.matmul %17, %7, %cst_7 {dimension_numbers = #tpu.dot_dimension_numbers<[2], [1], [1], [2], [0, 0, 0, 1, 1, 2], [0], [0]>} : vector<8x16x16xf32>, vector<8x16x16xf32>, vector<8x16x16xf32> -> vector<8x16x16xf32>
    "tpu.trace_stop"() : () -> ()
    %c0_8 = arith.constant 0 : index
    %c0_9 = arith.constant 0 : index
    %c0_10 = arith.constant 0 : index
    %19 = vector.load %arg3[%c0_8, %c0_9, %c0_10] : memref<8x16x128xf32, #tpu.memory_space<vmem>>, vector<8x16x128xf32>
    "tpu.trace_start"() <{level = 10 : i32, message = "hid,hde->hie"}> : () -> ()
    %cst_11 = arith.constant dense<0.000000e+00> : vector<8x16x128xf32>
    %20 = tpu.matmul %18, %19, %cst_11 {dimension_numbers = #tpu.dot_dimension_numbers<[2], [1], [1], [2], [0, 0, 0, 1, 1, 2], [0], [0]>} : vector<8x16x16xf32>, vector<8x16x128xf32>, vector<8x16x128xf32> -> vector<8x16x128xf32>
    "tpu.trace_stop"() : () -> ()
    %cst_12 = arith.constant dense<0.000000e+00> : vector<16x128xf32>
    %21 = vector.multi_reduction <add>, %20, %cst_12 [0] : vector<8x16x128xf32> to vector<16x128xf32>
    %c0_13 = arith.constant 0 : index
    %c0_14 = arith.constant 0 : index
    %22 = vector.load %arg4[%c0_13, %c0_14] : memref<1x128xf32, #tpu.memory_space<vmem>>, vector<1x128xf32>
    %23 = vector.broadcast %22 : vector<1x128xf32> to vector<16x128xf32>
    %24 = arith.addf %21, %23 : vector<16x128xf32>
    %c0_15 = arith.constant 0 : index
    %c0_16 = arith.constant 0 : index
    %25 = vector.load %arg5[%c0_15, %c0_16] : memref<16x128xf32, #tpu.memory_space<vmem>>, vector<16x128xf32>
    tpu.vector_store %arg5[%c0_15, %c0_16], %24 {strides = array<i32>} : memref<16x128xf32, #tpu.memory_space<vmem>>, vector<16x128xf32>,
    return
  }
  func.func @transform_0(%arg0: i32) -> (i32, i32) {
    %c0_i32 = arith.constant 0 : i32
    %c0_i32_0 = arith.constant 0 : i32
    return %c0_i32, %arg0 : i32, i32
  }
  func.func @transform_1(%arg0: i32) -> (i32, i32, i32) {
    %c0_i32 = arith.constant 0 : i32
    %c0_i32_0 = arith.constant 0 : i32
    %c0_i32_1 = arith.constant 0 : i32
    %c0_i32_2 = arith.constant 0 : i32
    return %c0_i32, %c0_i32_0, %c0_i32_1 : i32, i32, i32
  }
  func.func @transform_2(%arg0: i32) -> (i32, i32, i32) {
    %c0_i32 = arith.constant 0 : i32
    %c0_i32_0 = arith.constant 0 : i32
    %c0_i32_1 = arith.constant 0 : i32
    %c0_i32_2 = arith.constant 0 : i32
    return %c0_i32, %c0_i32_0, %c0_i32_1 : i32, i32, i32
  }
  func.func @transform_3(%arg0: i32) -> (i32, i32) {
    %c0_i32 = arith.constant 0 : i32
    %c0_i32_0 = arith.constant 0 : i32
    %c0_i32_1 = arith.constant 0 : i32
    return %c0_i32, %c0_i32_0 : i32, i32
  }
  func.func @transform_4(%arg0: i32) -> (i32, i32) {
    %c0_i32 = arith.constant 0 : i32
    %c0_i32_0 = arith.constant 0 : i32
    return %c0_i32, %arg0 : i32, i32
  }
}

</mosaic_0001>

<bundles_post_ra>
// kernel: self_attention_full.1
= control target key start
LH: loop header
LB: loop body
LE: loop exit
PB: predicated region body
PF: predicated region fallthrough
CT: control target
= control target key end

     0   :  { %s4704_s15 = smov 0   ;;  %s4706_s16 = smov 0   ;;  %s5521_s0 = inlined_call_operand.vmem [shape: f32[16,512], index: 0, kind: input, shape index: {}]   ;;  %s5522_s1 = inlined_call_operand.vmem [shape: f32[8,128,48], index: 1, kind: input, shape index: {}]   ;;  %s5523_s2 = inlined_call_operand.vmem [shape: f32[8,16,128], index: 2, kind: input, shape index: {}]   ;;  %s5524_s3 = inlined_call_operand.vmem [shape: f32[1,128], index: 3, kind: input, shape index: {}]   ;;  %s5525_s4 = inlined_call_operand.vmem [shape: f32[16,512], index: 4, kind: output, shape index: {}]  }
   0x1   :  { %s4708_s17 = smov 0  }
   0x2 LB: > { %s3335_s18 = sadd.s32 4294967295, %s4675_s17   ;;  %s4721_s19 = sadd.s32 1, %s4675_s17   ;;  %s4675_s17 = sphi %s4708_s17, %s5531_s17   ;;  %s4671_s16 = sphi %s4706_s16, %s5530_s16   ;;  %s4667_s15 = sphi %s4704_s15, %s5529_s15  }
   0x3   : > { %s18_s20 = ssub.s32 %s4675_s17, %s4721_s19  ;;  %s21_s21 = sadd.s32 1, %s4671_s16 }
   0x4   : > { %p19_p0 = scmp.eq.s32.totalorder %s18_s20, 0  ;;  %p28_p1 = scmp.ne.s32.totalorder %s4671_s16, %s4667_s15 }
   0x5   : > { %p29_p2 = scmp.eq.s32.totalorder %s4675_s17, 0  ;;  %p121_p3 = scmp.eq.s32.totalorder %s3335_s18, 3 }
   0x6   : > { %s4732_s22 = scalar_select %p19_p0, %s4671_s16, %s21_s21  }
   0x7   : > { %p30_p4 = por %p29_p2, %p28_p1  ;;  %p4734_p5 = por %p121_p3, %p28_p1 }
   0x8   : > { %p3338_p6 = scmp.ge.s32.totalorder %s4675_s17, 4 }
   0xa   : > { %152 = sbr.rel (%p3338_p6) target bundleno = 24 (0x18), region = 28 }
  0x11   : > { %155 = sbr.rel (!%p30_p4) target bundleno = 24 (0x18), region = 32  ;;  %s157_s24 = sand.u32 (%p30_p4), 1, %s4671_s16  }
  0x12   : > { %s3340_s25 = sshll.u32 (%p30_p4), %s4675_s17, 3  ;;  %s3339_s26 = sshll.u32 (%p30_p4), %s157_s24, 4 }
  0x13   : > { %s161_s29 = scalar_lea.vmem (%p30_p4), %s5521_s0, %s3340_s25  ;;  %s159_s30 = scalar_lea.vmem (%p30_p4), [#allocation2], %s3339_s26 }
  0x14   : > { %v191_v0 = vld [vmem:[%s161_s29] sm:$0xff] (%p30_p4) }
  0x15   : > { %v193_v1 = vld [vmem:[%s161_s29 + $0x20] sm:$0xff] (%p30_p4)  ;;  %192 = vst [vmem:[%s159_s30] sm:$0xff] (%p30_p4), %v191_v0 }
  0x16   : > { %194 = vst [vmem:[%s159_s30 + $0x8] sm:$0xff] (%p30_p4), %v193_v1 }
  0x18 PF: > { %p3341_p7 = scmp.ge.s32.totalorder %s4675_s17, 1  ;;  %p199_p8 = scmp.lt.s32.totalorder %s4675_s17, 5 }
  0x1a   : > { %p200_p9 = pnand %p3341_p7, %p199_p8 }
  0x1b   : > { %v232_v2 = vld [vmem:[%s5522_s1] sm:$0xff] (!%p200_p9)  ;;  %v233_v3 = vld [vmem:[%s5522_s1 + $0x8] sm:$0xff] (!%p200_p9)  ;;  %v234_v7 = vld [vmem:[%s5522_s1 + $0x10] sm:$0xff] (!%p200_p9)  ;;  %s206_s24 = sand.u32 (!%p200_p9), 1, %s4667_s15   ;;  %vm966_vm0 = vcmask (!%p200_p9), 130048   ;;  %s4677_s25 = smov (!%p200_p9), 112  }
  0x1c   : > { %203 = sbr.rel (%p200_p9) target bundleno = 1494 (0x5d6), region = 70  ;;  %v248_v4 = vld [vmem:[%s5522_s1 + $0x80] sm:$0xff] (!%p200_p9)  ;;  %v4101_v5 = vpack.c.bf16 (!%p200_p9), %v233_v3, %v232_v2  ;;  %v249_v6 = vld [vmem:[%s5522_s1 + $0x88] sm:$0xff] (!%p200_p9)  ;;  %v235_v8 = vld [vmem:[%s5522_s1 + $0x18] sm:$0xff] (!%p200_p9)  ;;  %s4783_s10 = sshll.u32 (!%p200_p9), %s206_s24, 4 }
  0x1d   : > { %v4133_v9 = vpack.c.bf16 (!%p200_p9), %v249_v6, %v248_v4  ;;  %v4105_v10 = vpack.c.bf16 (!%p200_p9), %v235_v8, %v234_v7  ;;  %v250_v11 = vld [vmem:[%s5522_s1 + $0x90] sm:$0xff] (!%p200_p9)  ;;  %v251_v12 = vld [vmem:[%s5522_s1 + $0x98] sm:$0xff] (!%p200_p9)  ;;  %v236_v13 = vld [vmem:[%s5522_s1 + $0x20] sm:$0xff] (!%p200_p9)  ;;  %s208_s30 = scalar_lea.vmem (!%p200_p9), [#allocation2], %s4783_s10  ;;  %s229_s21 = scalar_lea.vmem (!%p200_p9), [#allocation3], %s4783_s10 }
  0x1e   : > { %4102 = vmatprep.subr.bf16.mxu0 (!%p200_p9), %v4101_v5  ;;  %v4137_v14 = vpack.c.bf16 (!%p200_p9), %v251_v12, %v250_v11  ;;  %v237_v15 = vld [vmem:[%s5522_s1 + $0x28] sm:$0xff] (!%p200_p9)  ;;  %v252_v16 = vld [vmem:[%s5522_s1 + $0xa0] sm:$0xff] (!%p200_p9)  ;;  %v238_v20 = vld [vmem:[%s5522_s1 + $0x30] sm:$0xff] (!%p200_p9) }
  0x1f   : > { %v253_v17 = vld [vmem:[%s5522_s1 + $0xa8] sm:$0xff] (!%p200_p9)  ;;  %4134 = vmatprep.subr.bf16.mxu1 (!%p200_p9), %v4133_v9  ;;  %4104 = vmatpush3.bf16.msra.mxu0 (!%p200_p9), %v4101_v5  ;;  %v4109_v18 = vpack.c.bf16 (!%p200_p9), %v237_v15, %v236_v13  ;;  %v239_v21 = vld [vmem:[%s5522_s1 + $0x38] sm:$0xff] (!%p200_p9)  ;;  %v254_v22 = vld [vmem:[%s5522_s1 + $0xb0] sm:$0xff] (!%p200_p9) }
  0x20   : > { %4136 = vmatpush3.bf16.msra.mxu1 (!%p200_p9), %v4133_v9  ;;  %4106 = vmatprep.subr.bf16.mxu0 (!%p200_p9), %v4105_v10  ;;  %v4141_v19 = vpack.c.bf16 (!%p200_p9), %v253_v17, %v252_v16  ;;  %v255_v23 = vld [vmem:[%s5522_s1 + $0xb8] sm:$0xff] (!%p200_p9)  ;;  %v4113_v24 = vpack.c.bf16 (!%p200_p9), %v239_v21, %v238_v20  ;;  %v240_v26 = vld [vmem:[%s5522_s1 + $0x40] sm:$0xff] (!%p200_p9)  ;;  %v241_v27 = vld [vmem:[%s5522_s1 + $0x48] sm:$0xff] (!%p200_p9) }
  0x21   : > { %4138 = vmatprep.subr.bf16.mxu1 (!%p200_p9), %v4137_v14  ;;  %v4145_v25 = vpack.c.bf16 (!%p200_p9), %v255_v23, %v254_v22  ;;  %v4806_v28 = vld [vmem:[%s208_s30] sm:$0xff] (!%p200_p9)  ;;  %v257_v30 = vld [vmem:[%s5522_s1 + $0xc8] sm:$0xff] (!%p200_p9)  ;;  %v4117_v31 = vpack.c.bf16 (!%p200_p9), %v241_v27, %v240_v26  ;;  %v243_v34 = vld [vmem:[%s5522_s1 + $0x58] sm:$0xff] (!%p200_p9) }
  0x22   : > { %v256_v29 = vld [vmem:[%s5522_s1 + $0xc0] sm:$0xff] (!%p200_p9)  ;;  %3685 = vmatprep.mubr.f32.mxu0 (!%p200_p9), %v4806_v28  ;;  %3720 = vmatprep.mubr.f32.mxu1 (!%p200_p9), %v4806_v28  ;;  %v242_v33 = vld [vmem:[%s5522_s1 + $0x50] sm:$0xff] (!%p200_p9)  ;;  %v259_v36 = vld [vmem:[%s5522_s1 + $0xd8] sm:$0xff] (!%p200_p9) }
  0x23   : > { %4108 = vmatpush3.bf16.msra.mxu0 %v4105_v10  ;;  %v4149_v32 = vpack.c.bf16 %v257_v30, %v256_v29  ;;  %v258_v35 = vld [vmem:[%s5522_s1 + $0xd0] sm:$0xff]  ;;  %v4121_v37 = vpack.c.bf16 %v243_v34, %v242_v33  ;;  %v244_v39 = vld [vmem:[%s5522_s1 + $0x60] sm:$0xff]  ;;  %v245_v40 = vld [vmem:[%s5522_s1 + $0x68] sm:$0xff]  ;;  %s3410_s24 = sshll.u32 (%p4734_p5), %s3335_s18, 3 }
  0x24   : > { %4140 = vmatpush3.bf16.msra.mxu1 %v4137_v14  ;;  %4110 = vmatprep.subr.bf16.mxu0 %v4109_v18  ;;  %v4153_v38 = vpack.c.bf16 %v259_v36, %v258_v35  ;;  %v260_v41 = vld [vmem:[%s5522_s1 + $0xe0] sm:$0xff]  ;;  %v261_v42 = vld [vmem:[%s5522_s1 + $0xe8] sm:$0xff]  ;;  %v4125_v43 = vpack.c.bf16 %v245_v40, %v244_v39  ;;  %v246_v45 = vld [vmem:[%s5522_s1 + $0x70] sm:$0xff]  ;;  %s3242_s26 = scalar_lea.vmem (%p4734_p5), %s5525_s4, %s3410_s24 }
  0x25   : > { %4142 = vmatprep.subr.bf16.mxu1 %v4141_v19  ;;  %v4157_v44 = vpack.c.bf16 %v261_v42, %v260_v41  ;;  %v247_v46 = vld [vmem:[%s5522_s1 + $0x78] sm:$0xff]  ;;  %v262_v47 = vld [vmem:[%s5522_s1 + $0xf0] sm:$0xff]  ;;  %v264_v51 = vld [vmem:[%s5522_s1 + $0x100] sm:$0xff] }
  0x26   : > { %v263_v48 = vld [vmem:[%s5522_s1 + $0xf8] sm:$0xff]  ;;  %v4129_v49 = vpack.c.bf16 %v247_v46, %v246_v45  ;;  %v265_v52 = vld [vmem:[%s5522_s1 + $0x108] sm:$0xff]  ;;  %v280_v53 = vld [vmem:[%s5522_s1 + $0x180] sm:$0xff] }
  0x27   : > { %4112 = vmatpush3.bf16.msra.mxu0 %v4109_v18  ;;  %v4161_v50 = vpack.c.bf16 %v263_v48, %v262_v47  ;;  %v281_v54 = vld [vmem:[%s5522_s1 + $0x188] sm:$0xff]  ;;  %v4165_v55 = vpack.c.bf16 %v265_v52, %v264_v51  ;;  %v266_v57 = vld [vmem:[%s5522_s1 + $0x110] sm:$0xff]  ;;  %v267_v58 = vld [vmem:[%s5522_s1 + $0x118] sm:$0xff] }
  0x28   : > { %4144 = vmatpush3.bf16.msra.mxu1 %v4141_v19  ;;  %4114 = vmatprep.subr.bf16.mxu0 %v4113_v24  ;;  %v4197_v56 = vpack.c.bf16 %v281_v54, %v280_v53  ;;  %v282_v59 = vld [vmem:[%s5522_s1 + $0x190] sm:$0xff]  ;;  %v283_v60 = vld [vmem:[%s5522_s1 + $0x198] sm:$0xff]  ;;  %v4169_v62 = vpack.c.bf16 %v267_v58, %v266_v57  ;;  %v268_v0 = vld [vmem:[%s5522_s1 + $0x120] sm:$0xff] }
  0x29   : > { %4146 = vmatprep.subr.bf16.mxu1 %v4145_v25  ;;  %v4878_v61 = vld [vmem:[%s208_s30 + $0x8] sm:$0xff]  ;;  %v4201_v63 = vpack.c.bf16 %v283_v60, %v282_v59  ;;  %v284_v2 = vld [vmem:[%s5522_s1 + $0x1a0] sm:$0xff]  ;;  %v270_v6 = vld [vmem:[%s5522_s1 + $0x130] sm:$0xff]  ;;  %s4678_s30 = smov 96  }
  0x2a   : > { %v269_v1 = vld [vmem:[%s5522_s1 + $0x128] sm:$0xff]  ;;  %v271_v7 = vld [vmem:[%s5522_s1 + $0x138] sm:$0xff]  ;;  %v286_v8 = vld [vmem:[%s5522_s1 + $0x1b0] sm:$0xff] }
  0x2b   : > { %4116 = vmatpush3.bf16.msra.mxu0 %v4113_v24  ;;  %v285_v3 = vld [vmem:[%s5522_s1 + $0x1a8] sm:$0xff]  ;;  %v4173_v4 = vpack.c.bf16 %v269_v1, %v268_v0  ;;  %v287_v9 = vld [vmem:[%s5522_s1 + $0x1b8] sm:$0xff]  ;;  %v4177_v10 = vpack.c.bf16 %v271_v7, %v270_v6  ;;  %v272_v12 = vld [vmem:[%s5522_s1 + $0x140] sm:$0xff] }
  0x2c   : > { %4148 = vmatpush3.bf16.msra.mxu1 %v4145_v25  ;;  %4118 = vmatprep.subr.bf16.mxu0 %v4117_v31  ;;  %v4205_v5 = vpack.c.bf16 %v285_v3, %v284_v2  ;;  %v4209_v11 = vpack.c.bf16 %v287_v9, %v286_v8  ;;  %v273_v13 = vld [vmem:[%s5522_s1 + $0x148] sm:$0xff]  ;;  %v288_v14 = vld [vmem:[%s5522_s1 + $0x1c0] sm:$0xff]  ;;  %v274_v18 = vld [vmem:[%s5522_s1 + $0x150] sm:$0xff] }
  0x2d   : > { %4150 = vmatprep.subr.bf16.mxu1 %v4149_v32  ;;  %v289_v15 = vld [vmem:[%s5522_s1 + $0x1c8] sm:$0xff]  ;;  %v4181_v16 = vpack.c.bf16 %v273_v13, %v272_v12  ;;  %v275_v19 = vld [vmem:[%s5522_s1 + $0x158] sm:$0xff]  ;;  %v290_v20 = vld [vmem:[%s5522_s1 + $0x1d0] sm:$0xff] }
  0x2e   : > { %v4213_v17 = vpack.c.bf16 %v289_v15, %v288_v14  ;;  %v291_v21 = vld [vmem:[%s5522_s1 + $0x1d8] sm:$0xff]  ;;  %v4185_v22 = vpack.c.bf16 %v275_v19, %v274_v18  ;;  %v276_v24 = vld [vmem:[%s5522_s1 + $0x160] sm:$0xff]  ;;  %v277_v25 = vld [vmem:[%s5522_s1 + $0x168] sm:$0xff] }
  0x2f   : > { %4120 = vmatpush3.bf16.msra.mxu0 %v4117_v31  ;;  %v4217_v23 = vpack.c.bf16 %v291_v21, %v290_v20  ;;  %v292_v26 = vld [vmem:[%s5522_s1 + $0x1e0] sm:$0xff]  ;;  %v293_v27 = vld [vmem:[%s5522_s1 + $0x1e8] sm:$0xff]  ;;  %v4189_v29 = vpack.c.bf16 %v277_v25, %v276_v24  ;;  %v278_v31 = vld [vmem:[%s5522_s1 + $0x170] sm:$0xff] }
  0x30   : > { %4152 = vmatpush3.bf16.msra.mxu1 %v4149_v32  ;;  %4122 = vmatprep.subr.bf16.mxu0 %v4121_v37  ;;  %v4221_v30 = vpack.c.bf16 %v293_v27, %v292_v26  ;;  %v279_v32 = vld [vmem:[%s5522_s1 + $0x178] sm:$0xff]  ;;  %v294_v33 = vld [vmem:[%s5522_s1 + $0x1f0] sm:$0xff]  ;;  %v312_v39 = vld [vmem:[%s5522_s1 + $0x280] sm:$0xff] }
  0x31   : > { %4154 = vmatprep.subr.bf16.mxu1 %v4153_v38  ;;  %v295_v34 = vld [vmem:[%s5522_s1 + $0x1f8] sm:$0xff]  ;;  %v4193_v35 = vpack.c.bf16 %v279_v32, %v278_v31  ;;  %v313_v40 = vld [vmem:[%s5522_s1 + $0x288] sm:$0xff]  ;;  %v314_v45 = vld [vmem:[%s5522_s1 + $0x290] sm:$0xff] }
  0x32   : > { %v4225_v36 = vpack.c.bf16 %v295_v34, %v294_v33  ;;  %v4261_v42 = vpack.c.bf16 %v313_v40, %v312_v39  ;;  %v315_v46 = vld [vmem:[%s5522_s1 + $0x298] sm:$0xff]  ;;  %v316_v51 = vld [vmem:[%s5522_s1 + $0x2a0] sm:$0xff]  ;;  %v317_v52 = vld [vmem:[%s5522_s1 + $0x2a8] sm:$0xff] }
  0x33   : > { %4124 = vmatpush3.bf16.msra.mxu0 %v4121_v37  ;;  %v296_v37 = vld [vmem:[%s5522_s1 + $0x200] sm:$0xff]  ;;  %v4265_v48 = vpack.c.bf16 %v315_v46, %v314_v45  ;;  %v4269_v54 = vpack.c.bf16 %v317_v52, %v316_v51  ;;  %v318_v57 = vld [vmem:[%s5522_s1 + $0x2b0] sm:$0xff]  ;;  %v319_v58 = vld [vmem:[%s5522_s1 + $0x2b8] sm:$0xff] }
  0x34   : > { %4156 = vmatpush3.bf16.msra.mxu1 %v4153_v38  ;;  %4126 = vmatprep.subr.bf16.mxu0 %v4125_v43  ;;  %v297_v38 = vld [vmem:[%s5522_s1 + $0x208] sm:$0xff]  ;;  %v4273_v60 = vpack.c.bf16 %v319_v58, %v318_v57  ;;  %v320_v0 = vld [vmem:[%s5522_s1 + $0x2c0] sm:$0xff]  ;;  %v322_v6 = vld [vmem:[%s5522_s1 + $0x2d0] sm:$0xff] }
  0x35   : > { %4158 = vmatprep.subr.bf16.mxu1 %v4157_v44  ;;  %v4229_v41 = vpack.c.bf16 %v297_v38, %v296_v37  ;;  %v321_v1 = vld [vmem:[%s5522_s1 + $0x2c8] sm:$0xff]  ;;  %v323_v7 = vld [vmem:[%s5522_s1 + $0x2d8] sm:$0xff]  ;;  %v324_v12 = vld [vmem:[%s5522_s1 + $0x2e0] sm:$0xff] }
  0x36   : > { %v4277_v3 = vpack.c.bf16 %v321_v1, %v320_v0  ;;  %v4281_v9 = vpack.c.bf16 %v323_v7, %v322_v6  ;;  %v325_v13 = vld [vmem:[%s5522_s1 + $0x2e8] sm:$0xff]  ;;  %v326_v18 = vld [vmem:[%s5522_s1 + $0x2f0] sm:$0xff]  ;;  %v327_v19 = vld [vmem:[%s5522_s1 + $0x2f8] sm:$0xff] }
  0x37   : > { %4128 = vmatpush3.bf16.msra.mxu0 %v4125_v43  ;;  %v298_v43 = vld [vmem:[%s5522_s1 + $0x210] sm:$0xff]  ;;  %v4285_v15 = vpack.c.bf16 %v325_v13, %v324_v12  ;;  %v4289_v21 = vpack.c.bf16 %v327_v19, %v326_v18  ;;  %v344_v24 = vld [vmem:[%s5522_s1 + $0x380] sm:$0xff]  ;;  %v345_v25 = vld [vmem:[%s5522_s1 + $0x388] sm:$0xff] }
  0x38   : > { %4160 = vmatpush3.bf16.msra.mxu1 %v4157_v44  ;;  %4130 = vmatprep.subr.bf16.mxu0 %v4129_v49  ;;  %v299_v44 = vld [vmem:[%s5522_s1 + $0x218] sm:$0xff]  ;;  %v4325_v27 = vpack.c.bf16 %v345_v25, %v344_v24  ;;  %v346_v31 = vld [vmem:[%s5522_s1 + $0x390] sm:$0xff]  ;;  %v348_v37 = vld [vmem:[%s5522_s1 + $0x3a0] sm:$0xff] }
  0x39   : > { %4162 = vmatprep.subr.bf16.mxu1 %v4161_v50  ;;  %v4233_v47 = vpack.c.bf16 %v299_v44, %v298_v43  ;;  %v347_v32 = vld [vmem:[%s5522_s1 + $0x398] sm:$0xff]  ;;  %v349_v38 = vld [vmem:[%s5522_s1 + $0x3a8] sm:$0xff]  ;;  %v350_v43 = vld [vmem:[%s5522_s1 + $0x3b0] sm:$0xff] }
  0x3a   : > { %v4329_v34 = vpack.c.bf16 %v347_v32, %v346_v31  ;;  %v4333_v40 = vpack.c.bf16 %v349_v38, %v348_v37  ;;  %v351_v44 = vld [vmem:[%s5522_s1 + $0x3b8] sm:$0xff]  ;;  %v338_v52 = vld [vmem:[%s5522_s1 + $0x350] sm:$0xff]  ;;  %v340_v58 = vld [vmem:[%s5522_s1 + $0x360] sm:$0xff] }
  0x3b   : > { %4132 = vmatpush3.bf16.msra.mxu0 %v4129_v49  ;;  %v300_v49 = vld [vmem:[%s5522_s1 + $0x220] sm:$0xff]  ;;  %v4337_v46 = vpack.c.bf16 %v351_v44, %v350_v43  ;;  %v342_v1 = vld [vmem:[%s5522_s1 + $0x370] sm:$0xff]  ;;  %vm5196_vm1 = vmpackc.low %vm966_vm0, %vm966_vm0 }
  0x3c   : > { %4164 = vmatpush3.bf16.msra.mxu1 %v4161_v50  ;;  %4166 = vmatprep.subr.bf16.mxu0 %v4165_v55  ;;  %v301_v50 = vld [vmem:[%s5522_s1 + $0x228] sm:$0xff] }
  0x3d   : > { %4198 = vmatprep.subr.bf16.mxu1 %v4197_v56  ;;  %v4237_v53 = vpack.c.bf16 %v301_v50, %v300_v49  ;;  %v352_v49 = vld [vmem:[%s5522_s1 + $0x3c0] sm:$0xff] }
  0x3e   : > { %3686 = vmatmul.mubr.f32.vlgmr.msra.gmra.mrb[0].mxu0 %v4878_v61 }
  0x3f   : > { %3721 = vmatmul.mubr.f32.vlgmr.msra.gmra.mrb[0].mxu1 %v4878_v61  ;;  %4168 = vmatpush3.bf16.msra.mxu0 %v4165_v55  ;;  %v302_v55 = vld [vmem:[%s5522_s1 + $0x230] sm:$0xff] }
  0x40   : > { %4200 = vmatpush3.bf16.msra.mxu1 %v4197_v56  ;;  %4170 = vmatprep.subr.bf16.mxu0 %v4169_v62  ;;  %v303_v56 = vld [vmem:[%s5522_s1 + $0x238] sm:$0xff] }
  0x41   : > { %4202 = vmatprep.subr.bf16.mxu1 %v4201_v63  ;;  %3755 = vmatprep.mubr.f32.mxu0 %v4806_v28  ;;  %v4241_v59 = vpack.c.bf16 %v303_v56, %v302_v55  ;;  %v355_v55 = vld [vmem:[%s5522_s1 + $0x3d8] sm:$0xff] }
  0x42   : > { %3790 = vmatprep.mubr.f32.mxu1 %v4806_v28 }
  0x43   : > { %4172 = vmatpush3.bf16.msra.mxu0 %v4169_v62  ;;  %v304_v62 = vld [vmem:[%s5522_s1 + $0x240] sm:$0xff] }
  0x44   : > { %4204 = vmatpush3.bf16.msra.mxu1 %v4201_v63  ;;  %4174 = vmatprep.subr.bf16.mxu0 %v4173_v4  ;;  %v305_v63 = vld [vmem:[%s5522_s1 + $0x248] sm:$0xff] }
  0x45   : > { %4206 = vmatprep.subr.bf16.mxu1 %v4205_v5  ;;  %v4245_v2 = vpack.c.bf16 %v305_v63, %v304_v62  ;;  %v357_v62 = vld [vmem:[%s5522_s1 + $0x3e8] sm:$0xff] }
  0x47   : > { %4176 = vmatpush3.bf16.msra.mxu0 %v4173_v4  ;;  %v306_v4 = vld [vmem:[%s5522_s1 + $0x250] sm:$0xff] }
  0x48   : > { %4208 = vmatpush3.bf16.msra.mxu1 %v4205_v5  ;;  %4178 = vmatprep.subr.bf16.mxu0 %v4177_v10  ;;  %v307_v5 = vld [vmem:[%s5522_s1 + $0x258] sm:$0xff] }
  0x49   : > { %4210 = vmatprep.subr.bf16.mxu1 %v4209_v11  ;;  %v4249_v8 = vpack.c.bf16 %v307_v5, %v306_v4  ;;  %v359_v4 = vld [vmem:[%s5522_s1 + $0x3f8] sm:$0xff] }
  0x4b   : > { %4180 = vmatpush3.bf16.msra.mxu0 %v4177_v10  ;;  %v308_v10 = vld [vmem:[%s5522_s1 + $0x260] sm:$0xff] }
  0x4c   : > { %4212 = vmatpush3.bf16.msra.mxu1 %v4209_v11  ;;  %4182 = vmatprep.subr.bf16.mxu0 %v4181_v16  ;;  %v309_v11 = vld [vmem:[%s5522_s1 + $0x268] sm:$0xff] }
  0x4d   : > { %4214 = vmatprep.subr.bf16.mxu1 %v4213_v17  ;;  %v4253_v14 = vpack.c.bf16 %v309_v11, %v308_v10 }
  0x4f   : > { %4184 = vmatpush3.bf16.msra.mxu0 %v4181_v16  ;;  %v310_v16 = vld [vmem:[%s5522_s1 + $0x270] sm:$0xff] }
  0x50   : > { %4216 = vmatpush3.bf16.msra.mxu1 %v4213_v17  ;;  %4186 = vmatprep.subr.bf16.mxu0 %v4185_v22  ;;  %v311_v17 = vld [vmem:[%s5522_s1 + $0x278] sm:$0xff] }
  0x51   : > { %4218 = vmatprep.subr.bf16.mxu1 %v4217_v23  ;;  %v4257_v20 = vpack.c.bf16 %v311_v17, %v310_v16 }
  0x53   : > { %4188 = vmatpush3.bf16.msra.mxu0 %v4185_v22  ;;  %v328_v22 = vld [vmem:[%s5522_s1 + $0x300] sm:$0xff] }
  0x54   : > { %4220 = vmatpush3.bf16.msra.mxu1 %v4217_v23  ;;  %4190 = vmatprep.subr.bf16.mxu0 %v4189_v29  ;;  %v329_v23 = vld [vmem:[%s5522_s1 + $0x308] sm:$0xff] }
  0x55   : > { %4222 = vmatprep.subr.bf16.mxu1 %v4221_v30  ;;  %v4293_v26 = vpack.c.bf16 %v329_v23, %v328_v22 }
  0x57   : > { %4192 = vmatpush3.bf16.msra.mxu0 %v4189_v29  ;;  %v330_v29 = vld [vmem:[%s5522_s1 + $0x310] sm:$0xff] }
  0x58   : > { %4224 = vmatpush3.bf16.msra.mxu1 %v4221_v30  ;;  %4194 = vmatprep.subr.bf16.mxu0 %v4193_v35  ;;  %v331_v30 = vld [vmem:[%s5522_s1 + $0x318] sm:$0xff] }
  0x59   : > { %4226 = vmatprep.subr.bf16.mxu1 %v4225_v36  ;;  %v4297_v33 = vpack.c.bf16 %v331_v30, %v330_v29 }
  0x5b   : > { %4196 = vmatpush3.bf16.msra.mxu0 %v4193_v35  ;;  %v332_v35 = vld [vmem:[%s5522_s1 + $0x320] sm:$0xff] }
  0x5c   : > { %4228 = vmatpush3.bf16.msra.mxu1 %v4225_v36  ;;  %4230 = vmatprep.subr.bf16.mxu0 %v4229_v41  ;;  %v333_v36 = vld [vmem:[%s5522_s1 + $0x328] sm:$0xff] }
  0x5d   : > { %4262 = vmatprep.subr.bf16.mxu1 %v4261_v42  ;;  %v4301_v39 = vpack.c.bf16 %v333_v36, %v332_v35 }
  0x5e   : > { %3756 = vmatmul.mubr.f32.vlgmr.msra.gmra.mrb[2].mxu0 %v4878_v61 }
  0x5f   : > { %3791 = vmatmul.mubr.f32.vlgmr.msra.gmra.mrb[2].mxu1 %v4878_v61  ;;  %4232 = vmatpush3.bf16.msra.mxu0 %v4229_v41  ;;  %v334_v41 = vld [vmem:[%s5522_s1 + $0x330] sm:$0xff] }
  0x60   : > { %4264 = vmatpush3.bf16.msra.mxu1 %v4261_v42  ;;  %4234 = vmatprep.subr.bf16.mxu0 %v4233_v47  ;;  %v335_v42 = vld [vmem:[%s5522_s1 + $0x338] sm:$0xff] }
  0x61   : > { %4266 = vmatprep.subr.bf16.mxu1 %v4265_v48  ;;  %3825 = vmatprep.mubr.f32.mxu0 %v4806_v28  ;;  %v4305_v45 = vpack.c.bf16 %v335_v42, %v334_v41 }
  0x62   : > { %3860 = vmatprep.mubr.f32.mxu1 %v4806_v28 }
  0x63   : > { %4236 = vmatpush3.bf16.msra.mxu0 %v4233_v47  ;;  %v336_v47 = vld [vmem:[%s5522_s1 + $0x340] sm:$0xff] }
  0x64   : > { %4268 = vmatpush3.bf16.msra.mxu1 %v4265_v48  ;;  %4238 = vmatprep.subr.bf16.mxu0 %v4237_v53  ;;  %v337_v48 = vld [vmem:[%s5522_s1 + $0x348] sm:$0xff] }
  0x65   : > { %4270 = vmatprep.subr.bf16.mxu1 %v4269_v54  ;;  %v4309_v50 = vpack.c.bf16 %v337_v48, %v336_v47 }
  0x67   : > { %4240 = vmatpush3.bf16.msra.mxu0 %v4237_v53  ;;  %v339_v53 = vld [vmem:[%s5522_s1 + $0x358] sm:$0xff] }
  0x68   : > { %4272 = vmatpush3.bf16.msra.mxu1 %v4269_v54  ;;  %4242 = vmatprep.subr.bf16.mxu0 %v4241_v59  ;;  %v354_v54 = vld [vmem:[%s5522_s1 + $0x3d0] sm:$0xff]  ;;  %v4313_v56 = vpack.c.bf16 %v339_v53, %v338_v52 }
  0x69   : > { %4274 = vmatprep.subr.bf16.mxu1 %v4273_v60  ;;  %v4345_v57 = vpack.c.bf16 %v355_v55, %v354_v54 }
  0x6b   : > { %4244 = vmatpush3.bf16.msra.mxu0 %v4241_v59  ;;  %v341_v59 = vld [vmem:[%s5522_s1 + $0x368] sm:$0xff] }
  0x6c   : > { %4276 = vmatpush3.bf16.msra.mxu1 %v4273_v60  ;;  %4246 = vmatprep.subr.bf16.mxu0 %v4245_v2  ;;  %v356_v60 = vld [vmem:[%s5522_s1 + $0x3e0] sm:$0xff]  ;;  %v4317_v63 = vpack.c.bf16 %v341_v59, %v340_v58 }
  0x6d   : > { %4278 = vmatprep.subr.bf16.mxu1 %v4277_v3  ;;  %v4349_v0 = vpack.c.bf16 %v357_v62, %v356_v60 }
  0x6f   : > { %4248 = vmatpush3.bf16.msra.mxu0 %v4245_v2  ;;  %v343_v2 = vld [vmem:[%s5522_s1 + $0x378] sm:$0xff] }
  0x70   : > { %4280 = vmatpush3.bf16.msra.mxu1 %v4277_v3  ;;  %4250 = vmatprep.subr.bf16.mxu0 %v4249_v8  ;;  %v358_v3 = vld [vmem:[%s5522_s1 + $0x3f0] sm:$0xff]  ;;  %v4321_v5 = vpack.c.bf16 %v343_v2, %v342_v1 }
  0x71   : > { %4282 = vmatprep.subr.bf16.mxu1 %v4281_v9  ;;  %v4353_v6 = vpack.c.bf16 %v359_v4, %v358_v3 }
  0x73   : > { %4252 = vmatpush3.bf16.msra.mxu0 %v4249_v8 }
  0x74   : > { %4284 = vmatpush3.bf16.msra.mxu1 %v4281_v9  ;;  %4254 = vmatprep.subr.bf16.mxu0 %v4253_v14 }
  0x75   : > { %4286 = vmatprep.subr.bf16.mxu1 %v4285_v15 }
  0x77   : > { %4256 = vmatpush3.bf16.msra.mxu0 %v4253_v14 }
  0x78   : > { %4288 = vmatpush3.bf16.msra.mxu1 %v4285_v15  ;;  %4258 = vmatprep.subr.bf16.mxu0 %v4257_v20 }
  0x79   : > { %4290 = vmatprep.subr.bf16.mxu1 %v4289_v21 }
  0x7b   : > { %4260 = vmatpush3.bf16.msra.mxu0 %v4257_v20 }
  0x7c   : > { %4292 = vmatpush3.bf16.msra.mxu1 %v4289_v21  ;;  %4294 = vmatprep.subr.bf16.mxu0 %v4293_v26 }
  0x7d   : > { %4326 = vmatprep.subr.bf16.mxu1 %v4325_v27 }
  0x7e   : > { %3826 = vmatmul.mubr.f32.vlgmr.msra.gmra.mrb[4].mxu0 %v4878_v61 }
  0x7f   : > { %3861 = vmatmul.mubr.f32.vlgmr.msra.gmra.mrb[4].mxu1 %v4878_v61  ;;  %4296 = vmatpush3.bf16.msra.mxu0 %v4293_v26 }
  0x80   : > { %4328 = vmatpush3.bf16.msra.mxu1 %v4325_v27  ;;  %4298 = vmatprep.subr.bf16.mxu0 %v4297_v33 }
  0x81   : > { %4330 = vmatprep.subr.bf16.mxu1 %v4329_v34  ;;  %3895 = vmatprep.mubr.f32.mxu0 %v4806_v28 }
  0x82   : > { %3930 = vmatprep.mubr.f32.mxu1 %v4806_v28  ;;  %v353_v28 = vld [vmem:[%s5522_s1 + $0x3c8] sm:$0xff] }
  0x83   : > { %4300 = vmatpush3.bf16.msra.mxu0 %v4297_v33  ;;  %v4341_v51 = vpack.c.bf16 %v353_v28, %v352_v49 }
  0x84   : > { %4332 = vmatpush3.bf16.msra.mxu1 %v4329_v34  ;;  %4302 = vmatprep.subr.bf16.mxu0 %v4301_v39 }
  0x85   : > { %4334 = vmatprep.subr.bf16.mxu1 %v4333_v40 }
  0x87   : > { %4304 = vmatpush3.bf16.msra.mxu0 %v4301_v39 }
  0x88   : > { %4336 = vmatpush3.bf16.msra.mxu1 %v4333_v40  ;;  %4306 = vmatprep.subr.bf16.mxu0 %v4305_v45 }
  0x89   : > { %4338 = vmatprep.subr.bf16.mxu1 %v4337_v46 }
  0x8b   : > { %4308 = vmatpush3.bf16.msra.mxu0 %v4305_v45 }
  0x8c   : > { %4340 = vmatpush3.bf16.msra.mxu1 %v4337_v46  ;;  %4310 = vmatprep.subr.bf16.mxu0 %v4309_v50 }
  0x8d   : > { %4342 = vmatprep.subr.bf16.mxu1 %v4341_v51 }
  0x8f   : > { %4312 = vmatpush3.bf16.msra.mxu0 %v4309_v50 }
  0x90   : > { %4344 = vmatpush3.bf16.msra.mxu1 %v4341_v51  ;;  %4314 = vmatprep.subr.bf16.mxu0 %v4313_v56 }
  0x91   : > { %4346 = vmatprep.subr.bf16.mxu1 %v4345_v57 }
  0x93   : > { %4316 = vmatpush3.bf16.msra.mxu0 %v4313_v56 }
  0x94   : > { %4348 = vmatpush3.bf16.msra.mxu1 %v4345_v57  ;;  %4318 = vmatprep.subr.bf16.mxu0 %v4317_v63 }
  0x95   : > { %4350 = vmatprep.subr.bf16.mxu1 %v4349_v0 }
  0x97   : > { %4320 = vmatpush3.bf16.msra.mxu0 %v4317_v63 }
  0x98   : > { %4352 = vmatpush3.bf16.msra.mxu1 %v4349_v0  ;;  %4322 = vmatprep.subr.bf16.mxu0 %v4321_v5 }
  0x99   : > { %4354 = vmatprep.subr.bf16.mxu1 %v4353_v6 }
  0x9b   : > { %4324 = vmatpush3.bf16.msra.mxu0 %v4321_v5 }
  0x9c   : > { %4356 = vmatpush3.bf16.msra.mxu1 %v4353_v6 }
  0x9e   : > { %3896 = vmatmul.mubr.f32.vlgmr.msra.gmra.mrb[6].mxu0 %v4878_v61 }
  0x9f   : > { %3931 = vmatmul.mubr.f32.vlgmr.msra.gmra.mrb[6].mxu1 %v4878_v61 }
 0x111   : > { %v3687_v7 = vpop.f32.mrb[0].mxu0 }
 0x112   : > { %v426_v8 = vpop.f32.mrb[1].mxu0  ;;  %v3722_v9 = vpop.f32.mrb[0].mxu1 }
 0x113   : > { %v4549_v10 = vpack.i.bf16 %v3687_v7, %v426_v8  ;;  %3937 = vmatprep.mubr.msk.f32.mxu1 %vm966_vm0, %v426_v8  ;;  %v501_v11 = vpop.f32.mrb[1].mxu1 }
 0x114   : > { %v5159_v12 = vpack.i.bf16 %v3722_v9, %v501_v11 }
 0x115   : > { %4510 = vrot.lane.b32.xlu0 %v4549_v10, %s4677_s25 }
 0x119   : > { %4515 = vrot.lane.b32.xlu0 %v5159_v12, %s4677_s25 }
 0x131   : > { %v3757_v13 = vpop.f32.mrb[2].mxu0 }
 0x132   : > { %v576_v14 = vpop.f32.mrb[3].mxu0  ;;  %v3792_v15 = vpop.f32.mrb[2].mxu1 }
 0x133   : > { %v5162_v16 = vpack.i.bf16 %v3757_v13, %v576_v14  ;;  %v651_v61 = vpop.f32.mrb[3].mxu1 }
 0x134   : > { %v5164_v17 = vpack.i.bf16 %v3792_v15, %v651_v61 }
 0x135   : > { %4520 = vrot.lane.b32.xlu1 %v5162_v16, %s4677_s25 }
 0x139   : > { %4525 = vrot.lane.b32.xlu1 %v5164_v17, %s4677_s25 }
 0x151   : > { %v5168_v18 = vpop.f32.mrb[4].mxu0 }
 0x152   : > { %v5170_v19 = vpop.f32.mrb[4].mxu1  ;;  %v726_v20 = vpop.f32.mrb[5].mxu0 }
 0x153   : > { %v5173_v21 = vpack.i.bf16 %v5168_v18, %v726_v20  ;;  %v801_v22 = vpop.f32.mrb[5].mxu1  ;;  %3965 = vmatprep.mubr.msk.f32.mxu0 %vm966_vm0, %v726_v20 }
 0x154   : > { %v5177_v23 = vpack.i.bf16 %v5170_v19, %v801_v22 }
 0x155   : > { %4530 = vrot.lane.b32.xlu0 %v5173_v21, %s4677_s25 }
 0x156   : > { %4535 = vrot.lane.b32.xlu1 %v5177_v23, %s4677_s25 }
 0x171   : > { %v5181_v24 = vpop.f32.mrb[6].mxu0 }
 0x172   : > { %v5183_v25 = vpop.f32.mrb[6].mxu1  ;;  %v876_v26 = vpop.f32.mrb[7].mxu0 }
 0x173   : > { %v5186_v27 = vpack.i.bf16 %v5181_v24, %v876_v26  ;;  %v951_v29 = vpop.f32.mrb[7].mxu1 }
 0x174   : > { %v5189_v30 = vpack.i.bf16 %v5183_v25, %v951_v29 }
 0x175   : > { %4540 = vrot.lane.b32.xlu0 %v5186_v27, %s4677_s25 }
 0x176   : > { %4545 = vrot.lane.b32.xlu1 %v5189_v30, %s4677_s25 }
 0x17a   : > { %4550 = vrot.lane.b32.xlu1 %v4549_v10, %s4678_s30 }
 0x187   : > { %v4511_v31 = vpop.permute.xlu0 %4510 }
 0x188   : > { %v4513_v32 = vunpack.i.h.bf16 %v4511_v31  ;;  %v4512_v33 = vunpack.i.l.bf16 %v4511_v31 }
 0x18a   : > { %v4357_v35 = vpack.c.bf16 %v4513_v32, %v4512_v33 }
 0x18b   : > { %v4516_v36 = vpop.permute.xlu0 %4515 }
 0x18c   : > { %4359 = vmatprep.subr.msk.bf16.mxu1 %vm5196_vm1, %v4357_v35  ;;  %v4518_v37 = vunpack.i.h.bf16 %v4516_v36  ;;  %v4517_v38 = vunpack.i.l.bf16 %v4516_v36 }
 0x18d   : > { %4362 = vmatpush3.bf16.xpose.msk.msra.mxu1 %vm5196_vm1, %v4357_v35 }
 0x18e   : > { %v4363_v39 = vpack.c.bf16 %v4518_v37, %v4517_v38 }
 0x190   : > { %4365 = vmatprep.subr.msk.bf16.mxu1 %vm5196_vm1, %v4363_v39 }
 0x194   : > { %3938 = vmatmul.mubr.msk.f32.vlgmr.msra.gmra.mrb[8].mxu1 %vm966_vm0, %v3687_v7 }
 0x195   : > { %4368 = vmatpush3.bf16.xpose.msk.msra.mxu1 %vm5196_vm1, %v4363_v39  ;;  %3944 = vmatprep.mubr.msk.f32.mxu1 %vm966_vm0, %v501_v11 }
 0x19c   : > { %3945 = vmatmul.mubr.msk.f32.vlgmr.msra.gmra.mrb[10].mxu1 %vm966_vm0, %v3722_v9 }
 0x19d   : > { %3951 = vmatprep.mubr.msk.f32.mxu1 %vm966_vm0, %v576_v14 }
 0x1a7   : > { %v4521_v40 = vpop.permute.xlu1 %4520 }
 0x1a8   : > { %v4523_v41 = vunpack.i.h.bf16 %v4521_v40  ;;  %v4522_v42 = vunpack.i.l.bf16 %v4521_v40 }
 0x1aa   : > { %v4369_v43 = vpack.c.bf16 %v4523_v41, %v4522_v42 }
 0x1ab   : > { %v4526_v44 = vpop.permute.xlu1 %4525 }
 0x1ac   : > { %4371 = vmatprep.subr.msk.bf16.mxu1 %vm5196_vm1, %v4369_v43  ;;  %v4528_v45 = vunpack.i.h.bf16 %v4526_v44  ;;  %v4527_v46 = vunpack.i.l.bf16 %v4526_v44 }
 0x1ad   : > { %4374 = vmatpush3.bf16.xpose.msk.msra.mxu1 %vm5196_vm1, %v4369_v43 }
 0x1ae   : > { %v4375_v47 = vpack.c.bf16 %v4528_v45, %v4527_v46 }
 0x1b0   : > { %4377 = vmatprep.subr.msk.bf16.mxu1 %vm5196_vm1, %v4375_v47 }
 0x1b4   : > { %3952 = vmatmul.mubr.msk.f32.vlgmr.msra.gmra.mrb[12].mxu1 %vm966_vm0, %v3757_v13 }
 0x1b5   : > { %4380 = vmatpush3.bf16.xpose.msk.msra.mxu1 %vm5196_vm1, %v4375_v47  ;;  %3958 = vmatprep.mubr.msk.f32.mxu1 %vm966_vm0, %v651_v61 }
 0x1bc   : > { %3959 = vmatmul.mubr.msk.f32.vlgmr.msra.gmra.mrb[14].mxu1 %vm966_vm0, %v3792_v15 }
 0x1bd   : > { %3972 = vmatprep.mubr.msk.f32.mxu1 %vm966_vm0, %v801_v22 }
 0x1c7   : > { %v4531_v48 = vpop.permute.xlu0 %4530 }
 0x1c8   : > { %v4536_v49 = vpop.permute.xlu1 %4535  ;;  %v4533_v28 = vunpack.i.h.bf16 %v4531_v48  ;;  %v4532_v50 = vunpack.i.l.bf16 %v4531_v48 }
 0x1c9   : > { %v4538_v51 = vunpack.i.h.bf16 %v4536_v49  ;;  %v4537_v52 = vunpack.i.l.bf16 %v4536_v49 }
 0x1ca   : > { %v4381_v53 = vpack.c.bf16 %v4533_v28, %v4532_v50 }
 0x1cb   : > { %v4387_v54 = vpack.c.bf16 %v4538_v51, %v4537_v52 }
 0x1cc   : > { %4383 = vmatprep.subr.msk.bf16.mxu0 %vm5196_vm1, %v4381_v53 }
 0x1cd   : > { %4389 = vmatprep.subr.msk.bf16.mxu1 %vm5196_vm1, %v4387_v54  ;;  %4386 = vmatpush3.bf16.xpose.msk.msra.mxu0 %vm5196_vm1, %v4381_v53 }
 0x1ce   : > { %4392 = vmatpush3.bf16.xpose.msk.msra.mxu1 %vm5196_vm1, %v4387_v54 }
 0x1d4   : > { %3966 = vmatmul.mubr.msk.f32.vlgmr.msra.gmra.mrb[8].mxu0 %vm966_vm0, %v5168_v18 }
 0x1d5   : > { %3973 = vmatmul.mubr.msk.f32.vlgmr.msra.gmra.mrb[16].mxu1 %vm966_vm0, %v5170_v19  ;;  %3979 = vmatprep.mubr.msk.f32.mxu0 %vm966_vm0, %v876_v26 }
 0x1d6   : > { %3986 = vmatprep.mubr.msk.f32.mxu1 %vm966_vm0, %v951_v29 }
 0x1e7   : > { %v4541_v55 = vpop.permute.xlu0 %4540 }
 0x1e8   : > { %v4546_v56 = vpop.permute.xlu1 %4545  ;;  %v4543_v57 = vunpack.i.h.bf16 %v4541_v55  ;;  %v4542_v58 = vunpack.i.l.bf16 %v4541_v55 }
 0x1e9   : > { %v4548_v59 = vunpack.i.h.bf16 %v4546_v56  ;;  %v4547_v60 = vunpack.i.l.bf16 %v4546_v56 }
 0x1ea   : > { %v4393_v62 = vpack.c.bf16 %v4543_v57, %v4542_v58 }
 0x1eb   : > { %v4399_v63 = vpack.c.bf16 %v4548_v59, %v4547_v60 }
 0x1ec   : > { %v4551_v0 = vpop.permute.xlu1 %4550  ;;  %4395 = vmatprep.subr.msk.bf16.mxu0 %vm5196_vm1, %v4393_v62 }
 0x1ed   : > { %v4553_v1 = vunpack.i.h.bf16 %v4551_v0  ;;  %v4552_v2 = vunpack.i.l.bf16 %v4551_v0  ;;  %4401 = vmatprep.subr.msk.bf16.mxu1 %vm5196_vm1, %v4399_v63  ;;  %4398 = vmatpush3.bf16.xpose.msk.msra.mxu0 %vm5196_vm1, %v4393_v62 }
 0x1ee   : > { %4404 = vmatpush3.bf16.xpose.msk.msra.mxu1 %vm5196_vm1, %v4399_v63 }
 0x1ef   : > { %v4405_v3 = vpack.c.bf16 %v4553_v1, %v4552_v2 }
 0x1f1   : > { %4406 = vmatprep.subr.bf16.mxu0 %v4405_v3 }
 0x1f4   : > { %3980 = vmatmul.mubr.msk.f32.vlgmr.msra.gmra.mrb[10].mxu0 %vm966_vm0, %v5181_v24 }
 0x1f5   : > { %3987 = vmatmul.mubr.msk.f32.vlgmr.msra.gmra.mrb[18].mxu1 %vm966_vm0, %v5183_v25  ;;  %4408 = vmatpush3.bf16.msra.mxu0 %v4405_v3 }
 0x267   : > { %v3939_v4 = vpop.f32.mrb[8].mxu1 }
 0x268   : > { %v1041_v5 = vpop.f32.mrb[9].mxu1  ;;  %v1676_v6 = vsel %vm966_vm0, %v3939_v4, -inf }
 0x269   : > { %1677 = vmax.xlane.f32.xlu1 %v1676_v6  ;;  %v1673_v7 = vsel %vm966_vm0, %v1041_v5, -inf }
 0x26a   : > { %1674 = vmax.xlane.f32.xlu0 %v1673_v7 }
 0x26f   : > { %v5252_v8 = vpop.f32.mrb[10].mxu1 }
 0x270   : > { %v1130_v9 = vpop.f32.mrb[11].mxu1  ;;  %v1682_v10 = vsel %vm966_vm0, %v5252_v8, -inf }
 0x271   : > { %1683 = vmax.xlane.f32.xlu0 %v1682_v10  ;;  %v1679_v11 = vsel %vm966_vm0, %v1130_v9, -inf }
 0x275   : > { %1680 = vmax.xlane.f32.xlu0 %v1679_v11 }
 0x27a   : > { %4560 = vrot.lane.b32.xlu1 %v5162_v16, %s4678_s30 }
 0x287   : > { %v5259_v13 = vpop.f32.mrb[12].mxu1 }
 0x288   : > { %v5261_v14 = vpop.f32.mrb[13].mxu1  ;;  %v1688_v15 = vsel %vm966_vm0, %v5259_v13, -inf }
 0x289   : > { %1689 = vmax.xlane.f32.xlu0 %v1688_v15  ;;  %v1685_v19 = vsel %vm966_vm0, %v5261_v14, -inf }
 0x28f   : > { %v5265_v61 = vpop.f32.mrb[14].mxu1 }
 0x290   : > { %v5267_v18 = vpop.f32.mrb[15].mxu1 }
 0x291   : > { %v1691_v16 = vsel %vm966_vm0, %v5267_v18, -inf }
 0x29e   : > { %1686 = vmax.xlane.f32.xlu1 %v1685_v19 }
 0x29f   : > { %4555 = vrot.lane.b32.xlu0 %v5159_v12, %s4678_s30  ;;  %v1694_v12 = vsel %vm966_vm0, %v5265_v61, -inf }
 0x2a2   : > { %1692 = vmax.xlane.f32.xlu1 %v1691_v16 }
 0x2a7   : > { %v5275_v20 = vpop.f32.mrb[8].mxu0 }
 0x2a8   : > { %v5277_v22 = vpop.f32.mrb[16].mxu1  ;;  %v5279_v24 = vpop.f32.mrb[9].mxu0  ;;  %v1700_v31 = vsel %vm966_vm0, %v5275_v20, -inf }
 0x2a9   : > { %v5281_v25 = vpop.f32.mrb[17].mxu1  ;;  %v1697_v26 = vsel %vm966_vm0, %v5279_v24, -inf  ;;  %v1706_v32 = vsel %vm966_vm0, %v5277_v22, -inf }
 0x2aa   : > { %1698 = vmax.xlane.f32.xlu1 %v1697_v26  ;;  %v1703_v29 = vsel %vm966_vm0, %v5281_v25, -inf }
 0x2ae   : > { %1704 = vmax.xlane.f32.xlu1 %v1703_v29 }
 0x2be   : > { %1695 = vmax.xlane.f32.xlu0 %v1694_v12 }
 0x2c2   : > { %1701 = vmax.xlane.f32.xlu0 %v1700_v31 }
 0x2c6   : > { %1707 = vmax.xlane.f32.xlu0 %v1706_v32 }
 0x2c7   : > { %v5293_v33 = vpop.f32.mrb[10].mxu0 }
 0x2c8   : > { %v5295_v34 = vpop.f32.mrb[18].mxu1  ;;  %v5297_v35 = vpop.f32.mrb[11].mxu0  ;;  %v1712_v36 = vsel %vm966_vm0, %v5293_v33, -inf }
 0x2c9   : > { %v5301_v37 = vpop.f32.mrb[19].mxu1  ;;  %v1709_v38 = vsel %vm966_vm0, %v5297_v35, -inf  ;;  %v1718_v39 = vsel %vm966_vm0, %v5295_v34, -inf }
 0x2ca   : > { %1713 = vmax.xlane.f32.xlu0 %v1712_v36  ;;  %1710 = vmax.xlane.f32.xlu1 %v1709_v38  ;;  %v1715_v40 = vsel %vm966_vm0, %v5301_v37, -inf }
 0x2ce   : > { %1719 = vmax.xlane.f32.xlu0 %v1718_v39  ;;  %1716 = vmax.xlane.f32.xlu1 %v1715_v40 }
 0x2df   : > { %4565 = vrot.lane.b32.xlu1 %v5164_v17, %s4678_s30 }
 0x2f6   : > { %v1678_v41 = vpop.xlane.xlu1 %1677 }
 0x2f7   : > { %v1722_v42 = vsub.f32 %v3939_v4, %v1678_v41  ;;  %v1675_v43 = vpop.xlane.xlu0 %1674 }
 0x2f8   : > { %v1721_v44 = vsub.f32 %v1041_v5, %v1675_v43 }
 0x2f9   : > { %v1739_v45 = vmul.f32 1.442695, %v1722_v42 }
 0x2fa   : > { %v1737_v46 = vmul.f32 1.442695, %v1721_v44  ;;  %v4561_v47 = vpop.permute.xlu1 %4560 }
 0x2fb   : > { %4589 = vpow2.f32 %v1739_v45  ;;  %v4563_v48 = vunpack.i.h.bf16 %v4561_v47  ;;  %v4562_v49 = vunpack.i.l.bf16 %v4561_v47 }
 0x2fc   : > { %4591 = vpow2.f32 %v1737_v46 }
 0x2fd   : > { %v5311_v28 = vpack.c.bf16 %v4563_v48, %v4562_v49 }
 0x2fe   : > { %v1684_v50 = vpop.xlane.xlu0 %1683 }
 0x2ff   : > { %4414 = vmatprep.subr.bf16.mxu0 %v5311_v28  ;;  %v1724_v1 = vsub.f32 %v5252_v8, %v1684_v50 }
 0x301   : > { %v1743_v2 = vmul.f32 1.442695, %v1724_v1 }
 0x302   : > { %v1681_v51 = vpop.xlane.xlu0 %1680 }
 0x303   : > { %v1723_v52 = vsub.f32 %v1130_v9, %v1681_v51 }
 0x305   : > { %v5314_v53 = vpop.eup %4589  ;;  %v1741_v17 = vmul.f32 1.442695, %v1723_v52 }
 0x306   : > { %v5316_v54 = vpop.eup %4591  ;;  %v1772_v55 = vsel %vm966_vm0, %v5314_v53, 0.0 }
 0x307   : > { %4593 = vpow2.f32 %v1741_v17  ;;  %1773 = vadd.xlane.f32.xlu0 %v1772_v55  ;;  %v1769_v56 = vsel %vm966_vm0, %v5316_v54, 0.0 }
 0x308   : > { %1770 = vadd.xlane.f32.xlu1 %v1769_v56  ;;  %4595 = vpow2.f32 %v1743_v2 }
 0x311   : > { %v5322_v57 = vpop.eup %4593 }
 0x312   : > { %v1775_v58 = vsel %vm966_vm0, %v5322_v57, 0.0  ;;  %v5331_v11 = vpop.eup %4595 }
 0x313   : > { %1776 = vadd.xlane.f32.xlu1 %v1775_v58 }
 0x316   : > { %v1690_v59 = vpop.xlane.xlu0 %1689 }
 0x317   : > { %v1726_v3 = vsub.f32 %v5259_v13, %v1690_v59  ;;  %v1778_v13 = vsel %vm966_vm0, %v5331_v11, 0.0 }
 0x319   : > { %v1747_v6 = vmul.f32 1.442695, %v1726_v3 }
 0x31a   : > { %v4556_v60 = vpop.permute.xlu0 %4555 }
 0x31b   : > { %v4558_v62 = vunpack.i.h.bf16 %v4556_v60  ;;  %v4557_v63 = vunpack.i.l.bf16 %v4556_v60 }
 0x31d   : > { %v4409_v0 = vpack.c.bf16 %v4558_v62, %v4557_v63  ;;  %4570 = vrot.lane.b32.xlu0 %v5173_v21, %s4678_s30 }
 0x31f   : > { %4410 = vmatprep.subr.bf16.mxu1 %v4409_v0 }
 0x320   : > { %4412 = vmatpush3.bf16.msra.mxu1 %v4409_v0 }
 0x32b   : > { %v1687_v4 = vpop.xlane.xlu1 %1686 }
 0x32c   : > { %v1725_v5 = vsub.f32 %v5261_v14, %v1687_v4 }
 0x32e   : > { %v1745_v7 = vmul.f32 1.442695, %v1725_v5 }
 0x32f   : > { %v1693_v9 = vpop.xlane.xlu1 %1692 }
 0x330   : > { %4597 = vpow2.f32 %v1745_v7  ;;  %v1727_v29 = vsub.f32 %v5267_v18, %v1693_v9 }
 0x331   : > { %4599 = vpow2.f32 %v1747_v6 }
 0x332   : > { %v1749_v32 = vmul.f32 1.442695, %v1727_v29 }
 0x337   : > { %v1699_v10 = vpop.xlane.xlu1 %1698 }
 0x338   : > { %v1729_v21 = vsub.f32 %v5279_v24, %v1699_v10 }
 0x33a   : > { %v5334_v15 = vpop.eup %4597  ;;  %v1753_v8 = vmul.f32 1.442695, %v1729_v21 }
 0x33b   : > { %v1781_v14 = vsel %vm966_vm0, %v5334_v15, 0.0  ;;  %v5340_v19 = vpop.eup %4599  ;;  %v1705_v41 = vpop.xlane.xlu1 %1704 }
 0x33c   : > { %4601 = vpow2.f32 %v1753_v8  ;;  %1779 = vadd.xlane.f32.xlu0 %v1778_v13  ;;  %1782 = vadd.xlane.f32.xlu1 %v1781_v14  ;;  %v1784_v16 = vsel %vm966_vm0, %v5340_v19, 0.0  ;;  %v1731_v44 = vsub.f32 %v5281_v25, %v1705_v41 }
 0x33e   : > { %v1757_v46 = vmul.f32 1.442695, %v1731_v44 }
 0x340   : > { %1785 = vadd.xlane.f32.xlu0 %v1784_v16 }
 0x346   : > { %v5344_v26 = vpop.eup %4601 }
 0x347   : > { %v1793_v24 = vsel %vm966_vm0, %v5344_v26, 0.0 }
 0x348   : > { %1794 = vadd.xlane.f32.xlu1 %v1793_v24 }
 0x34b   : > { %v1696_v12 = vpop.xlane.xlu0 %1695 }
 0x34c   : > { %v1728_v31 = vsub.f32 %v5265_v61, %v1696_v12 }
 0x34e   : > { %v1751_v36 = vmul.f32 1.442695, %v1728_v31 }
 0x34f   : > { %v1702_v38 = vpop.xlane.xlu0 %1701 }
 0x350   : > { %4603 = vpow2.f32 %v1751_v36  ;;  %v1730_v39 = vsub.f32 %v5275_v20, %v1702_v38 }
 0x351   : > { %4605 = vpow2.f32 %v1749_v32 }
 0x352   : > { %v1755_v40 = vmul.f32 1.442695, %v1730_v39 }
 0x353   : > { %v1708_v42 = vpop.xlane.xlu0 %1707 }
 0x354   : > { %v1732_v43 = vsub.f32 %v5277_v22, %v1708_v42  ;;  %4607 = vpow2.f32 %v1755_v40 }
 0x356   : > { %v1759_v45 = vmul.f32 1.442695, %v1732_v43 }
 0x357   : > { %v1711_v18 = vpop.xlane.xlu1 %1710 }
 0x358   : > { %4609 = vpow2.f32 %v1759_v45  ;;  %v1733_v20 = vsub.f32 %v5297_v35, %v1711_v18  ;;  %v1714_v35 = vpop.xlane.xlu0 %1713 }
 0x359   : > { %4575 = vrot.lane.b32.xlu1 %v5177_v23, %s4678_s30  ;;  %4611 = vpow2.f32 %v1757_v46 }
 0x35a   : > { %v5355_v61 = vpop.eup %4603  ;;  %v1761_v22 = vmul.f32 1.442695, %v1733_v20 }
 0x35b   : > { %v1717_v47 = vpop.xlane.xlu1 %1716  ;;  %v1790_v48 = vsel %vm966_vm0, %v5355_v61, 0.0  ;;  %v5360_v49 = vpop.eup %4605 }
 0x35c   : > { %1791 = vadd.xlane.f32.xlu0 %v1790_v48  ;;  %v1735_v25 = vsub.f32 %v5301_v37, %v1717_v47  ;;  %v1787_v23 = vsel %vm966_vm0, %v5360_v49, 0.0  ;;  %4613 = vpow2.f32 %v1761_v22  ;;  %v1734_v37 = vsub.f32 %v5293_v33, %v1714_v35  ;;  %v1720_v63 = vpop.xlane.xlu0 %1719 }
 0x35d   : > { %v1736_v1 = vsub.f32 %v5295_v34, %v1720_v63 }
 0x35e   : > { %v5365_v51 = vpop.eup %4607  ;;  %v1765_v55 = vmul.f32 1.442695, %v1735_v25  ;;  %v1763_v0 = vmul.f32 1.442695, %v1734_v37  ;;  %v2545_v37 = vld [vmem:[%s5523_s2] sm:$0xff] }
 0x35f   : > { %v4566_v50 = vpop.permute.xlu1 %4565  ;;  %v1796_v58 = vsel %vm966_vm0, %v5365_v51, 0.0  ;;  %v1767_v4 = vmul.f32 1.442695, %v1736_v1 }
 0x360   : > { %v4568_v52 = vunpack.i.h.bf16 %v4566_v50  ;;  %v4567_v17 = vunpack.i.l.bf16 %v4566_v50  ;;  %1788 = vadd.xlane.f32.xlu0 %v1787_v23  ;;  %4615 = vpow2.f32 %v1765_v55 }
 0x361   : > { %4617 = vpow2.f32 %v1763_v0 }
 0x362   : > { %v5367_v56 = vpack.c.bf16 %v4568_v52, %v4567_v17  ;;  %v5371_v59 = vpop.eup %4609  ;;  %4619 = vpow2.f32 %v1767_v4 }
 0x363   : > { %v1802_v60 = vsel %vm966_vm0, %v5371_v59, 0.0  ;;  %v5377_v62 = vpop.eup %4611 }
 0x364   : > { %1797 = vadd.xlane.f32.xlu0 %v1796_v58  ;;  %4418 = vmatprep.subr.bf16.mxu1 %v5367_v56  ;;  %v1799_v2 = vsel %vm966_vm0, %v5377_v62, 0.0 }
 0x366   : > { %v5382_v3 = vpop.eup %4613 }
 0x367   : > { %v1805_v33 = vsel %vm966_vm0, %v5382_v3, 0.0 }
 0x368   : > { %1803 = vadd.xlane.f32.xlu0 %v1802_v60 }
 0x36a   : > { %v5386_v5 = vpop.eup %4615 }
 0x36b   : > { %v1811_v6 = vsel %vm966_vm0, %v5386_v5, 0.0  ;;  %v5390_v34 = vpop.eup %4617 }
 0x36c   : > { %1800 = vadd.xlane.f32.xlu0 %v1799_v2  ;;  %v1808_v7 = vsel %vm966_vm0, %v5390_v34, 0.0  ;;  %v5394_v9 = vpop.eup %4619 }
 0x36d   : > { %v1814_v10 = vsel %vm966_vm0, %v5394_v9, 0.0 }
 0x370   : > { %1806 = vadd.xlane.f32.xlu0 %v1805_v33 }
 0x374   : > { %1812 = vadd.xlane.f32.xlu0 %v1811_v6 }
 0x37d   : > { %1809 = vadd.xlane.f32.xlu1 %v1808_v7 }
 0x381   : > { %1815 = vadd.xlane.f32.xlu1 %v1814_v10 }
 0x38a   : > { %4580 = vrot.lane.b32.xlu0 %v5186_v27, %s4678_s30 }
 0x392   : > { %4585 = vrot.lane.b32.xlu1 %v5189_v30, %s4678_s30 }
 0x394   : > { %v1774_v21 = vpop.xlane.xlu0 %1773 }
 0x395   : > { %4621 = vrcp.f32 %v1774_v21  ;;  %v1771_v8 = vpop.xlane.xlu1 %1770 }
 0x396   : > { %4623 = vrcp.f32 %v1771_v8 }
 0x398   : > { %v4571_v13 = vpop.permute.xlu0 %4570 }
 0x399   : > { %v4573_v24 = vunpack.i.h.bf16 %v4571_v13  ;;  %v4572_v29 = vunpack.i.l.bf16 %v4571_v13  ;;  %v2548_v13 = vld [vmem:[%s5523_s2 + $0x18] sm:$0xff] }
 0x39b   : > { %v4421_v27 = vpack.c.bf16 %v4573_v24, %v4572_v29 }
 0x39f   : > { %v4622_v14 = vpop.eup %4621 }
 0x3a0   : > { %v4624_v16 = vpop.eup %4623  ;;  %v1777_v12 = vpop.xlane.xlu1 %1776  ;;  %v1820_v32 = vmul.f32 %v4622_v14, %v5314_v53 }
 0x3a1   : > { %4625 = vrcp.f32 %v1777_v12  ;;  %v1818_v31 = vmul.f32 %v4624_v16, %v5316_v54 }
 0x3a3   : > { %3993 = vmatprep.mubr.msk.f32.mxu0 %vm966_vm0, %v1818_v31  ;;  %v2549_v31 = vld [vmem:[%s5523_s2 + $0x20] sm:$0xff] }
 0x3a4   : > { %3994 = vmatmul.mubr.msk.f32.vlgmr.msra.gmra.mrb[12].mxu0 %vm966_vm0, %v1820_v32 }
 0x3a5   : > { %4416 = vmatpush3.bf16.msra.mxu0 %v5311_v28 }
 0x3a6   : > { %4422 = vmatprep.subr.bf16.mxu0 %v4421_v27 }
 0x3ab   : > { %v4626_v30 = vpop.eup %4625 }
 0x3ac   : > { %v1822_v36 = vmul.f32 %v4626_v30, %v5322_v57 }
 0x3ae   : > { %4000 = vmatprep.mubr.msk.f32.mxu1 %vm966_vm0, %v1822_v36  ;;  %v2552_v36 = vld [vmem:[%s5523_s2 + $0x38] sm:$0xff] }
 0x3c9   : > { %v1780_v38 = vpop.xlane.xlu0 %1779  ;;  %v1783_v39 = vpop.xlane.xlu1 %1782 }
 0x3ca   : > { %4627 = vrcp.f32 %v1780_v38 }
 0x3cb   : > { %4629 = vrcp.f32 %v1783_v39 }
 0x3cd   : > { %v1786_v54 = vpop.xlane.xlu0 %1785 }
 0x3ce   : > { %4631 = vrcp.f32 %v1786_v54 }
 0x3d4   : > { %v4628_v53 = vpop.eup %4627 }
 0x3d5   : > { %v4630_v40 = vpop.eup %4629  ;;  %v1824_v41 = vmul.f32 %v4628_v53, %v5331_v11  ;;  %v1795_v42 = vpop.xlane.xlu1 %1794 }
 0x3d6   : > { %4633 = vrcp.f32 %v1795_v42  ;;  %v1826_v28 = vmul.f32 %v4630_v40, %v5334_v15  ;;  %v2554_v42 = vld [vmem:[%s5523_s2 + $0x48] sm:$0xff] }
 0x3d7   : > { %4001 = vmatmul.mubr.msk.f32.vlgmr.msra.gmra.mrb[20].mxu1 %vm966_vm0, %v1824_v41  ;;  %v2553_v41 = vld [vmem:[%s5523_s2 + $0x40] sm:$0xff] }
 0x3d8   : > { %v4632_v43 = vpop.eup %4631  ;;  %4007 = vmatprep.mubr.msk.f32.mxu0 %vm966_vm0, %v1826_v28  ;;  %4420 = vmatpush3.bf16.msra.mxu1 %v5367_v56  ;;  %v4453_v28 = vpack.c.bf16 %v2554_v42, %v2553_v41 }
 0x3d9   : > { %v1828_v57 = vmul.f32 %v4632_v43, %v5340_v19  ;;  %v4576_v44 = vpop.permute.xlu1 %4575  ;;  %v2555_v43 = vld [vmem:[%s5523_s2 + $0x50] sm:$0xff] }
 0x3da   : > { %v4578_v45 = vunpack.i.h.bf16 %v4576_v44  ;;  %v4577_v18 = vunpack.i.l.bf16 %v4576_v44 }
 0x3db   : > { %4008 = vmatmul.mubr.msk.f32.vlgmr.msra.gmra.mrb[14].mxu0 %vm966_vm0, %v1828_v57  ;;  %v2556_v57 = vld [vmem:[%s5523_s2 + $0x58] sm:$0xff] }
 0x3dc   : > { %v4425_v46 = vpack.c.bf16 %v4578_v45, %v4577_v18  ;;  %4424 = vmatpush3.bf16.msra.mxu0 %v4421_v27  ;;  %v4457_v18 = vpack.c.bf16 %v2556_v57, %v2555_v43 }
 0x3de   : > { %4426 = vmatprep.subr.bf16.mxu1 %v4425_v46 }
 0x3e0   : > { %v4634_v11 = vpop.eup %4633 }
 0x3e1   : > { %v1834_v15 = vmul.f32 %v4634_v11, %v5344_v26 }
 0x3e3   : > { %4021 = vmatprep.mubr.msk.f32.mxu0 %vm966_vm0, %v1834_v15  ;;  %v2557_v15 = vld [vmem:[%s5523_s2 + $0x60] sm:$0xff] }
 0x3e9   : > { %v1792_v20 = vpop.xlane.xlu0 %1791 }
 0x3ea   : > { %4635 = vrcp.f32 %v1792_v20  ;;  %v2558_v20 = vld [vmem:[%s5523_s2 + $0x68] sm:$0xff] }
 0x3ed   : > { %v1789_v47 = vpop.xlane.xlu0 %1788 }
 0x3ee   : > { %4637 = vrcp.f32 %v1789_v47  ;;  %v4461_v47 = vpack.c.bf16 %v2558_v20, %v2557_v15 }
 0x3f1   : > { %v1798_v48 = vpop.xlane.xlu0 %1797 }
 0x3f2   : > { %4639 = vrcp.f32 %v1798_v48 }
 0x3f4   : > { %v4636_v22 = vpop.eup %4635 }
 0x3f5   : > { %v1804_v19 = vpop.xlane.xlu0 %1803  ;;  %v1832_v52 = vmul.f32 %v4636_v22, %v5355_v61  ;;  %v2559_v22 = vld [vmem:[%s5523_s2 + $0x70] sm:$0xff] }
 0x3f6   : > { %4641 = vrcp.f32 %v1804_v19 }
 0x3f8   : > { %v4638_v25 = vpop.eup %4637 }
 0x3f9   : > { %v1801_v50 = vpop.xlane.xlu0 %1800  ;;  %v1830_v23 = vmul.f32 %v4638_v25, %v5360_v49  ;;  %v2560_v25 = vld [vmem:[%s5523_s2 + $0x78] sm:$0xff] }
 0x3fa   : > { %4643 = vrcp.f32 %v1801_v50  ;;  %v4465_v50 = vpack.c.bf16 %v2560_v25, %v2559_v22 }
 0x3fb   : > { %4014 = vmatprep.mubr.msk.f32.mxu1 %vm966_vm0, %v1830_v23 }
 0x3fc   : > { %v4640_v26 = vpop.eup %4639  ;;  %4015 = vmatmul.mubr.msk.f32.vlgmr.msra.gmra.mrb[22].mxu1 %vm966_vm0, %v1832_v52 }
 0x3fd   : > { %v1836_v17 = vmul.f32 %v4640_v26, %v5365_v51  ;;  %4428 = vmatpush3.bf16.msra.mxu1 %v4425_v46  ;;  %v1807_v35 = vpop.xlane.xlu0 %1806  ;;  %v2546_v51 = vld [vmem:[%s5523_s2 + $0x8] sm:$0xff] }
 0x3fe   : > { %4645 = vrcp.f32 %v1807_v35  ;;  %v4437_v4 = vpack.c.bf16 %v2546_v51, %v2545_v37  ;;  %v3408_v35 = vld [vmem:[%s5524_s3] ss:$0 sm:$0xff] }
 0x3ff   : > { %4022 = vmatmul.mubr.msk.f32.vlgmr.msra.gmra.mrb[16].mxu0 %vm966_vm0, %v1836_v17 }
 0x400   : > { %v4642_v56 = vpop.eup %4641 }
 0x401   : > { %v1813_v55 = vpop.xlane.xlu0 %1812  ;;  %v1840_v60 = vmul.f32 %v4642_v56, %v5371_v59 }
 0x402   : > { %4647 = vrcp.f32 %v1813_v55 }
 0x404   : > { %v4644_v58 = vpop.eup %4643 }
 0x405   : > { %v4581_v49 = vpop.permute.xlu0 %4580  ;;  %v1838_v61 = vmul.f32 %v4644_v58, %v5377_v62 }
 0x406   : > { %v4583_v63 = vunpack.i.h.bf16 %v4581_v49  ;;  %v4582_v0 = vunpack.i.l.bf16 %v4581_v49 }
 0x407   : > { %4028 = vmatprep.mubr.msk.f32.mxu1 %vm966_vm0, %v1838_v61 }
 0x408   : > { %v4646_v1 = vpop.eup %4645  ;;  %v4429_v2 = vpack.c.bf16 %v4583_v63, %v4582_v0  ;;  %4029 = vmatmul.mubr.msk.f32.vlgmr.msra.gmra.mrb[24].mxu1 %vm966_vm0, %v1840_v60 }
 0x409   : > { %v1842_v62 = vmul.f32 %v4646_v1, %v5382_v3  ;;  %v2547_v3 = vld [vmem:[%s5523_s2 + $0x10] sm:$0xff] }
 0x40a   : > { %4430 = vmatprep.subr.bf16.mxu0 %v4429_v2  ;;  %v1810_v33 = vpop.xlane.xlu1 %1809 }
 0x40b   : > { %4649 = vrcp.f32 %v1810_v33  ;;  %4432 = vmatpush3.bf16.msra.mxu0 %v4429_v2  ;;  %4035 = vmatprep.mubr.msk.f32.mxu0 %vm966_vm0, %v1842_v62 }
 0x40c   : > { %v4648_v6 = vpop.eup %4647  ;;  %4438 = vmatprep.subr.bf16.mxu0 %v4437_v4 }
 0x40d   : > { %v1846_v59 = vmul.f32 %v4648_v6, %v5386_v5  ;;  %v4441_v5 = vpack.c.bf16 %v2548_v13, %v2547_v3 }
 0x40e   : > { %v1816_v7 = vpop.xlane.xlu1 %1815 }
 0x40f   : > { %4651 = vrcp.f32 %v1816_v7  ;;  %4042 = vmatprep.mubr.msk.f32.mxu1 %vm966_vm0, %v1846_v59 }
 0x412   : > { %v4586_v10 = vpop.permute.xlu1 %4585 }
 0x413   : > { %v4588_v21 = vunpack.i.h.bf16 %v4586_v10  ;;  %v4587_v8 = vunpack.i.l.bf16 %v4586_v10 }
 0x415   : > { %v4650_v14 = vpop.eup %4649  ;;  %v4433_v16 = vpack.c.bf16 %v4588_v21, %v4587_v8 }
 0x416   : > { %v1844_v24 = vmul.f32 %v4650_v14, %v5390_v34  ;;  %v2550_v34 = vld [vmem:[%s5523_s2 + $0x28] sm:$0xff] }
 0x417   : > { %4434 = vmatprep.subr.bf16.mxu1 %v4433_v16  ;;  %v4445_v30 = vpack.c.bf16 %v2550_v34, %v2549_v31 }
 0x418   : > { %4036 = vmatmul.mubr.msk.f32.vlgmr.msra.gmra.mrb[18].mxu0 %vm966_vm0, %v1844_v24  ;;  %4436 = vmatpush3.bf16.msra.mxu1 %v4433_v16 }
 0x419   : > { %v4652_v29 = vpop.eup %4651  ;;  %4440 = vmatpush3.bf16.msra.mxu0 %v4437_v4 }
 0x41a   : > { %v1848_v12 = vmul.f32 %v4652_v29, %v5394_v9  ;;  %4442 = vmatprep.subr.bf16.mxu0 %v4441_v5  ;;  %v2551_v9 = vld [vmem:[%s5523_s2 + $0x30] sm:$0xff] }
 0x41b   : > { %v4449_v54 = vpack.c.bf16 %v2552_v36, %v2551_v9 }
 0x41c   : > { %4043 = vmatmul.mubr.msk.f32.vlgmr.msra.gmra.mrb[26].mxu1 %vm966_vm0, %v1848_v12 }
 0x477   : > { %v3995_v32 = vpop.f32.mrb[12].mxu0 }
 0x478   : > { %v1927_v27 = vpop.f32.mrb[13].mxu0 }
 0x479   : > { %4049 = vmatprep.mubr.msk.f32.mxu0 %vm966_vm0, %v1927_v27 }
 0x47a   : > { %4050 = vmatmul.mubr.msk.f32.vlgmr.msra.gmra.mrb[20].mxu0 %vm966_vm0, %v3995_v32 }
 0x47b   : > { %4444 = vmatpush3.bf16.msra.mxu0 %v4441_v5 }
 0x47c   : > { %4446 = vmatprep.subr.bf16.mxu0 %v4445_v30 }
 0x4aa   : > { %v4002_v38 = vpop.f32.mrb[20].mxu1 }
 0x4ab   : > { %v2014_v39 = vpop.f32.mrb[21].mxu1 }
 0x4ac   : > { %4056 = vmatprep.mubr.msk.f32.mxu0 %vm966_vm0, %v2014_v39 }
 0x4ad   : > { %4057 = vmatmul.mubr.msk.f32.vlgmr.msra.gmra.mrb[20].mxu0 %vm966_vm0, %v4002_v38 }
 0x4ae   : > { %v4009_v53 = vpop.f32.mrb[14].mxu0  ;;  %4448 = vmatpush3.bf16.msra.mxu0 %v4445_v30 }
 0x4af   : > { %v2101_v40 = vpop.f32.mrb[15].mxu0  ;;  %4450 = vmatprep.subr.bf16.mxu0 %v4449_v54 }
 0x4b0   : > { %4063 = vmatprep.mubr.msk.f32.mxu0 %vm966_vm0, %v2101_v40 }
 0x4b5   : > { %4064 = vmatmul.mubr.msk.f32.vlgmr.msra.gmra.mrb[20].mxu0 %vm966_vm0, %v4009_v53 }
 0x4b6   : > { %4452 = vmatpush3.bf16.msra.mxu0 %v4449_v54 }
 0x4b7   : > { %4454 = vmatprep.subr.bf16.mxu0 %v4453_v28 }
 0x4cf   : > { %v4016_v44 = vpop.f32.mrb[22].mxu1 }
 0x4d0   : > { %v2188_v45 = vpop.f32.mrb[23].mxu1 }
 0x4d1   : > { %4070 = vmatprep.mubr.msk.f32.mxu0 %vm966_vm0, %v2188_v45 }
 0x4d2   : > { %v4023_v46 = vpop.f32.mrb[16].mxu0  ;;  %4071 = vmatmul.mubr.msk.f32.vlgmr.msra.gmra.mrb[20].mxu0 %vm966_vm0, %v4016_v44 }
 0x4d3   : > { %v2275_v11 = vpop.f32.mrb[17].mxu0  ;;  %4456 = vmatpush3.bf16.msra.mxu0 %v4453_v28 }
 0x4d4   : > { %4077 = vmatprep.mubr.msk.f32.mxu0 %vm966_vm0, %v2275_v11  ;;  %4458 = vmatprep.subr.bf16.mxu0 %v4457_v18 }
 0x4da   : > { %4078 = vmatmul.mubr.msk.f32.vlgmr.msra.gmra.mrb[20].mxu0 %vm966_vm0, %v4023_v46 }
 0x4db   : > { %v4030_v48 = vpop.f32.mrb[24].mxu1  ;;  %4460 = vmatpush3.bf16.msra.mxu0 %v4457_v18 }
 0x4dc   : > { %v2362_v19 = vpop.f32.mrb[25].mxu1  ;;  %4462 = vmatprep.subr.bf16.mxu0 %v4461_v47 }
 0x4dd   : > { %4084 = vmatprep.mubr.msk.f32.mxu0 %vm966_vm0, %v2362_v19 }
 0x4e2   : > { %4085 = vmatmul.mubr.msk.f32.vlgmr.msra.gmra.mrb[20].mxu0 %vm966_vm0, %v4030_v48 }
 0x4e3   : > { %4464 = vmatpush3.bf16.msra.mxu0 %v4461_v47 }
 0x4e4   : > { %4466 = vmatprep.subr.bf16.mxu0 %v4465_v50 }
 0x4eb   : > { %v4037_v23 = vpop.f32.mrb[18].mxu0 }
 0x4ec   : > { %v2449_v52 = vpop.f32.mrb[19].mxu0 }
 0x4ed   : > { %4091 = vmatprep.mubr.msk.f32.mxu0 %vm966_vm0, %v2449_v52 }
 0x4ee   : > { %4092 = vmatmul.mubr.msk.f32.vlgmr.msra.gmra.mrb[20].mxu0 %vm966_vm0, %v4037_v23 }
 0x4ef   : > { %4468 = vmatpush3.bf16.msra.mxu0 %v4465_v50  ;;  %v4044_v26 = vpop.f32.mrb[26].mxu1 }
 0x4f0   : > { %v2536_v17 = vpop.f32.mrb[27].mxu1 }
 0x4f1   : > { %4098 = vmatprep.mubr.msk.f32.mxu0 %vm966_vm0, %v2536_v17 }
 0x4f6   : > { %4099 = vmatmul.mubr.msk.f32.vlgmr.msra.gmra.mrb[20].mxu0 %vm966_vm0, %v4044_v26 }
 0x5c7   : > { %3240 = sbr.rel (!%p4734_p5) target bundleno = 1494 (0x5d6), region = 78 }
 0x5c9   : > { %v4100_v55 = vpop.f32.mrb[20].mxu0 }
 0x5ca   : > { %v3231_v56 = vadd.f32 %v4100_v55, %v3408_v35  ;;  %v3200_v58 = vpop.f32.mrb[21].mxu0 }
 0x5cb   : > { %v3230_v49 = vadd.f32 %v3408_v35, %v3200_v58 }
 0x5cc   : > { %3233 = vst [vmem:[%s229_s21 + $0x8] sm:$0xff] %v3231_v56 }
 0x5cd   : > { %3232 = vst [vmem:[%s229_s21] sm:$0xff] %v3230_v49 }
 0x5d3   : > { %v3274_v37 = vld [vmem:[%s229_s21 + $0x8] sm:$0xff] }
 0x5d4   : > { %v3272_v61 = vld [vmem:[%s229_s21] sm:$0xff]  ;;  %3275 = vst [vmem:[%s3242_s26 + $0x20] sm:$0xff] %v3274_v37 }
 0x5d5   : > { %3273 = vst [vmem:[%s3242_s26] sm:$0xff] %v3272_v61 }
 0x5d6 PF: > { %p11_p10 = scmp.ge.s32.totalorder %s4721_s19, 6   ;;  %s5529_s15 = smov %s4671_s16 }
 0x5d7   : > { %s5530_s16 = smov %s4732_s22  ;;  %s5531_s17 = smov %s4721_s19 }
 0x5d8   :  { %13 = sbr.rel (!%p11_p10) target bundleno = 2 (0x2), region = 147 }

</bundles_post_ra>
